<compile_context>
chip_gen: v5e
topology: v5e:2x2
jax: 0.10.0
libtpu: 0.0.40
codegen_flags: <defaults>
</compile_context>

<pallas_src>
import math
from functools import partial

import jax
import jax.numpy as jnp
from jax.experimental import pallas as pl
from jax.experimental.pallas import tpu as pltpu


_MXU_DTYPE = jnp.bfloat16

_COMPILER_PARAMS = pltpu.CompilerParams(
    dimension_semantics=("parallel",),
    vmem_limit_bytes=64 * 1024 * 1024,
)


# ----------------------------- in-kernel helpers ----------------------------

def _layer_norm(x, g, b, eps):
    """Matches torch ref: a2*(x-mean)/sqrt(std**2+eps)+b2 with unbiased std."""
    d = x.shape[-1]
    mean = jnp.mean(x, axis=-1, keepdims=True)
    xc = x - mean
    var = jnp.sum(xc * xc, axis=-1, keepdims=True) * (1.0 / (d - 1))
    return g * xc * jax.lax.rsqrt(var + eps) + b


def _mha(y_q, kv, bias, wq_ref, bq_ref, wk_ref, bk_ref, wv_ref, bv_ref,
         wo_ref, bo_ref, ctx_scratch, num_heads):
    """Multi-head attention on one batch block.

    y_q  : [Tq, D] f32 (pre-normed query input)
    kv   : [Tk, D] f32 (key/value input; encoder memory is NOT normed)
    bias : additive mask bias, broadcastable to [Tq, Tk] (0 keep / -1e9 drop)
    Weights (refs) are bf16; biases are f32 [1, D].
    """
    _, D = y_q.shape
    dk = D // num_heads
    scale = 1.0 / math.sqrt(dk)

    yq_bf = y_q.astype(_MXU_DTYPE)
    kv_bf = kv.astype(_MXU_DTYPE)

    # Full-D projections: bf16 operands, f32 accumulation on the MXU.
    q = jnp.dot(yq_bf, wq_ref[...], preferred_element_type=jnp.float32) + bq_ref[...]
    k = jnp.dot(kv_bf, wk_ref[...], preferred_element_type=jnp.float32) + bk_ref[...]
    v = jnp.dot(kv_bf, wv_ref[...], preferred_element_type=jnp.float32) + bv_ref[...]
    q = q * scale                       # fold 1/sqrt(dk) once on [Tq, D]

    q_bf = q.astype(_MXU_DTYPE)
    k_bf = k.astype(_MXU_DTYPE)
    v_bf = v.astype(_MXU_DTYPE)

    for h in range(num_heads):          # static unroll; H is small
        sl = slice(h * dk, (h + 1) * dk)
        # scores: contract dk directly (no materialized k.T), bf16 -> f32 acc
        s = jax.lax.dot_general(q_bf[:, sl], k_bf[:, sl],
                                (((1,), (1,)), ((), ())),
                                preferred_element_type=jnp.float32)   # [Tq, Tk]
        s = s + bias
        s = s - jnp.max(s, axis=-1, keepdims=True)
        p = jnp.exp(s)
        p = p * pl.reciprocal(jnp.sum(p, axis=-1, keepdims=True), approx=True)
        ctx = jnp.dot(p.astype(_MXU_DTYPE), v_bf[:, sl],
                      preferred_element_type=jnp.float32)             # [Tq, dk]
        ctx_scratch[:, sl] = ctx.astype(ctx_scratch.dtype)

    # Single full-K output projection of the concatenated heads.
    out = jnp.dot(ctx_scratch[...], wo_ref[...],
                  preferred_element_type=jnp.float32) + bo_ref[...]
    return out


# --------------------------- fused per-layer kernel --------------------------

def _decoder_layer_kernel(
    x_ref, mem_ref, tgt_pad_ref, src_keep_ref,
    ln0_g_ref, ln0_b_ref,
    wq0_ref, bq0_ref, wk0_ref, bk0_ref, wv0_ref, bv0_ref, wo0_ref, bo0_ref,
    ln1_g_ref, ln1_b_ref,
    wq1_ref, bq1_ref, wk1_ref, bk1_ref, wv1_ref, bv1_ref, wo1_ref, bo1_ref,
    ln2_g_ref, ln2_b_ref,
    w1_ref, b1_ref, w2_ref, b2_ref,
    fin_g_ref, fin_b_ref,
    o_ref,
    ctx_scratch,
    *, num_heads, eps, apply_final_norm):

    x = x_ref[0].astype(jnp.float32)        # [T, D]
    mem = mem_ref[0].astype(jnp.float32)    # [S, D]
    T = x.shape[0]

    # ---- mask biases (computed ONCE per block, reused by every head) ----
    row = jax.lax.broadcasted_iota(jnp.int32, (T, T), 0)
    col = jax.lax.broadcasted_iota(jnp.int32, (T, T), 1)
    causal = row >= col                                    # subsequent mask
    tgt_keep = tgt_pad_ref[0] != 0                         # [1, T] key padding
    self_bias = jnp.where(causal & tgt_keep, 0.0, -1e9).astype(jnp.float32)
    src_bias = jnp.where(src_keep_ref[0] != 0, 0.0, -1e9).astype(jnp.float32)

    # ---- sublayer 1: masked self-attention ----
    y = _layer_norm(x, ln0_g_ref[...], ln0_b_ref[...], eps)
    x = x + _mha(y, y, self_bias,
                 wq0_ref, bq0_ref, wk0_ref, bk0_ref, wv0_ref, bv0_ref,
                 wo0_ref, bo0_ref, ctx_scratch, num_heads)

    # ---- sublayer 2: source attention over encoder memory ----
    y = _layer_norm(x, ln1_g_ref[...], ln1_b_ref[...], eps)
    x = x + _mha(y, mem, src_bias,
                 wq1_ref, bq1_ref, wk1_ref, bk1_ref, wv1_ref, bv1_ref,
                 wo1_ref, bo1_ref, ctx_scratch, num_heads)

    # ---- sublayer 3: position-wise FFN ----
    y = _layer_norm(x, ln2_g_ref[...], ln2_b_ref[...], eps)
    h = jnp.maximum(
        jnp.dot(y.astype(_MXU_DTYPE), w1_ref[...],
                preferred_element_type=jnp.float32) + b1_ref[...], 0.0)
    ffn = jnp.dot(h.astype(_MXU_DTYPE), w2_ref[...],
                  preferred_element_type=jnp.float32) + b2_ref[...]
    x = x + ffn

    if apply_final_norm:    # Decoder.norm fused into the last layer's kernel
        x = _layer_norm(x, fin_g_ref[...], fin_b_ref[...], eps)

    o_ref[0] = x.astype(o_ref.dtype)


# ------------------------------ host wrappers --------------------------------

def decoder_layer(x, memory, tgt_pad, src_keep, p, fin_g, fin_b, *,
                  num_heads, eps=1e-6, apply_final_norm=False):
    B, T, D = x.shape
    S = memory.shape[1]
    d_ff = p["ff_w1"].shape[1]

    def rep(shape):                         # replicated (weight) block
        return pl.BlockSpec(shape, lambda b, _z=(0,) * len(shape): _z)

    vD = rep((1, D))
    wDD = rep((D, D))

    in_specs = [
        pl.BlockSpec((1, T, D), lambda b: (b, 0, 0)),     # x
        pl.BlockSpec((1, S, D), lambda b: (b, 0, 0)),     # memory
        pl.BlockSpec((1, 1, T), lambda b: (b, 0, 0)),     # tgt key-padding keep
        pl.BlockSpec((1, 1, S), lambda b: (b, 0, 0)),     # src keep
        vD, vD,                                           # ln0
        wDD, vD, wDD, vD, wDD, vD, wDD, vD,               # self-attn
        vD, vD,                                           # ln1
        wDD, vD, wDD, vD, wDD, vD, wDD, vD,               # src-attn
        vD, vD,                                           # ln2
        rep((D, d_ff)), rep((1, d_ff)), rep((d_ff, D)), vD,   # FFN
        vD, vD,                                           # final LN params
    ]

    sa, ca = p["self_attn"], p["src_attn"]
    args = (
        x, memory, tgt_pad, src_keep,
        p["ln0_g"], p["ln0_b"],
        sa["wq"], sa["bq"], sa["wk"], sa["bk"], sa["wv"], sa["bv"], sa["wo"], sa["bo"],
        p["ln1_g"], p["ln1_b"],
        ca["wq"], ca["bq"], ca["wk"], ca["bk"], ca["wv"], ca["bv"], ca["wo"], ca["bo"],
        p["ln2_g"], p["ln2_b"],
        p["ff_w1"], p["ff_b1"], p["ff_w2"], p["ff_b2"],
        fin_g, fin_b,
    )

    return pl.pallas_call(
        partial(_decoder_layer_kernel, num_heads=num_heads, eps=eps,
                apply_final_norm=apply_final_norm),
        out_shape=jax.ShapeDtypeStruct((B, T, D), jnp.float32),
        grid=(B,),
        in_specs=in_specs,
        out_specs=pl.BlockSpec((1, T, D), lambda b: (b, 0, 0)),
        scratch_shapes=[pltpu.VMEM((T, D), _MXU_DTYPE)],   # concat'd ctx heads
        compiler_params=_COMPILER_PARAMS,
    )(*args)


# --------------------------- model composition ------------------------------

def _prep_attn(a, D):
    """Weights -> bf16 (halves DMA/VMEM; MXU consumes bf16 anyway), biases f32 [1,D]."""
    return dict(
        wq=a["wq"].astype(_MXU_DTYPE), bq=a["bq"].reshape(1, D).astype(jnp.float32),
        wk=a["wk"].astype(_MXU_DTYPE), bk=a["bk"].reshape(1, D).astype(jnp.float32),
        wv=a["wv"].astype(_MXU_DTYPE), bv=a["bv"].reshape(1, D).astype(jnp.float32),
        wo=a["wo"].astype(_MXU_DTYPE), bo=a["bo"].reshape(1, D).astype(jnp.float32),
    )


def _prep_layer(p, D, d_ff):
    return dict(
        self_attn=_prep_attn(p["self_attn"], D),
        src_attn=_prep_attn(p["src_attn"], D),
        ff_w1=p["ff_w1"].astype(_MXU_DTYPE),
        ff_b1=p["ff_b1"].reshape(1, d_ff).astype(jnp.float32),
        ff_w2=p["ff_w2"].astype(_MXU_DTYPE),
        ff_b2=p["ff_b2"].reshape(1, D).astype(jnp.float32),
        ln0_g=p["ln0_g"].reshape(1, D), ln0_b=p["ln0_b"].reshape(1, D),
        ln1_g=p["ln1_g"].reshape(1, D), ln1_b=p["ln1_b"].reshape(1, D),
        ln2_g=p["ln2_g"].reshape(1, D), ln2_b=p["ln2_b"].reshape(1, D),
    )


def decoder_forward(x, memory, src_mask, tgt_mask, layer_params, final_ln,
                    num_heads, eps=1e-6):
    B, T, D = x.shape
    S = memory.shape[1]
    assert D % num_heads == 0
    d_ff = layer_params[0]["ff_w1"].shape[1]

    # tgt_mask = key_padding & subsequent (standard make_std_mask). The last
    # query row of that mask is exactly the key-padding vector, so we DMA only
    # a (B,1,T) vector and rebuild the causal part with iota inside the kernel.
    # TODO(synk): an arbitrary (non pad&causal) tgt_mask would need the full
    # (B,T,T) mask DMA path.
    tgt_full = jnp.broadcast_to(tgt_mask, (B, T, T)).astype(jnp.int32)
    tgt_pad = tgt_full[:, T - 1:T, :]                              # (B,1,T)
    src_keep = jnp.broadcast_to(src_mask, (B, 1, S)).astype(jnp.int32)

    fin_g = final_ln["g"].reshape(1, D).astype(jnp.float32)
    fin_b = final_ln["b"].reshape(1, D).astype(jnp.float32)

    prepped = [_prep_layer(p, D, d_ff) for p in layer_params]
    n = len(prepped)
    for i, p in enumerate(prepped):
        x = decoder_layer(x, memory, tgt_pad, src_keep, p, fin_g, fin_b,
                          num_heads=num_heads, eps=eps,
                          apply_final_norm=(i == n - 1))
    return x


# ------------------------------- init / main --------------------------------

def _init_attn_params(key, d_model):
    ks = jax.random.split(key, 4)

    def w(k):
        return (0.02 * jax.random.normal(k, (d_model, d_model))).astype(jnp.float32)

    return dict(
        wq=w(ks[0]), bq=jnp.zeros((d_model,), jnp.float32),
        wk=w(ks[1]), bk=jnp.zeros((d_model,), jnp.float32),
        wv=w(ks[2]), bv=jnp.zeros((d_model,), jnp.float32),
        wo=w(ks[3]), bo=jnp.zeros((d_model,), jnp.float32),
    )


def _init_layer_params(key, d_model, d_ff):
    k0, k1, k2, k3 = jax.random.split(key, 4)
    return dict(
        self_attn=_init_attn_params(k0, d_model),
        src_attn=_init_attn_params(k1, d_model),
        ff_w1=(0.02 * jax.random.normal(k2, (d_model, d_ff))).astype(jnp.float32),
        ff_b1=jnp.zeros((d_ff,), jnp.float32),
        ff_w2=(0.02 * jax.random.normal(k3, (d_ff, d_model))).astype(jnp.float32),
        ff_b2=jnp.zeros((d_model,), jnp.float32),
        ln0_g=jnp.ones((d_model,), jnp.float32), ln0_b=jnp.zeros((d_model,), jnp.float32),
        ln1_g=jnp.ones((d_model,), jnp.float32), ln1_b=jnp.zeros((d_model,), jnp.float32),
        ln2_g=jnp.ones((d_model,), jnp.float32), ln2_b=jnp.zeros((d_model,), jnp.float32),
    )


if __name__ == "__main__":
    B, T, S = 2, 8, 8              # batch, target seq, source seq
    # D=128 keeps every block lane-dense (last dim == 128 lanes); still small.
    D, H, D_FF, N_LAYERS = 128, 4, 256, 2

    key = jax.random.PRNGKey(0)
    k_x, k_mem, k_layer = jax.random.split(key, 3)

    x = jax.random.normal(k_x, (B, T, D), dtype=jnp.float32)
    memory = jax.random.normal(k_mem, (B, S, D), dtype=jnp.float32)

    # src_mask: [B, 1, S] all-keep; tgt_mask: [B, T, T] pad & subsequent mask
    src_mask = jnp.ones((B, 1, S), dtype=jnp.int32)
    tgt_mask = jnp.tril(jnp.ones((T, T), dtype=jnp.int32))[None, :, :].repeat(B, axis=0)

    # clones() deep-copies one layer -> all N layers start with identical params
    one_layer = _init_layer_params(k_layer, D, D_FF)
    layer_params = [one_layer for _ in range(N_LAYERS)]
    final_ln = dict(g=jnp.ones((D,), jnp.float32), b=jnp.zeros((D,), jnp.float32))

    out = decoder_forward(x, memory, src_mask, tgt_mask, layer_params, final_ln, H)
    out = jax.block_until_ready(out)
    assert out.shape == (B, T, D)
    assert bool(jnp.all(jnp.isfinite(out)))
    print("KERNEL_OK")
</pallas_src>

<mosaic_0001>
module attributes {stable_mosaic.version = 11 : i64} {
  func.func @_decoder_layer_kernel(%arg0: i32, %arg1: memref<1x8x128xf32, #tpu.memory_space<vmem>>, %arg2: memref<1x8x128xf32, #tpu.memory_space<vmem>>, %arg3: memref<1x1x8xi32, #tpu.memory_space<vmem>>, %arg4: memref<1x1x8xi32, #tpu.memory_space<vmem>>, %arg5: memref<1x128xf32, #tpu.memory_space<vmem>>, %arg6: memref<1x128xf32, #tpu.memory_space<vmem>>, %arg7: memref<128x128xbf16, #tpu.memory_space<vmem>>, %arg8: memref<1x128xf32, #tpu.memory_space<vmem>>, %arg9: memref<128x128xbf16, #tpu.memory_space<vmem>>, %arg10: memref<1x128xf32, #tpu.memory_space<vmem>>, %arg11: memref<128x128xbf16, #tpu.memory_space<vmem>>, %arg12: memref<1x128xf32, #tpu.memory_space<vmem>>, %arg13: memref<128x128xbf16, #tpu.memory_space<vmem>>, %arg14: memref<1x128xf32, #tpu.memory_space<vmem>>, %arg15: memref<1x128xf32, #tpu.memory_space<vmem>>, %arg16: memref<1x128xf32, #tpu.memory_space<vmem>>, %arg17: memref<128x128xbf16, #tpu.memory_space<vmem>>, %arg18: memref<1x128xf32, #tpu.memory_space<vmem>>, %arg19: memref<128x128xbf16, #tpu.memory_space<vmem>>, %arg20: memref<1x128xf32, #tpu.memory_space<vmem>>, %arg21: memref<128x128xbf16, #tpu.memory_space<vmem>>, %arg22: memref<1x128xf32, #tpu.memory_space<vmem>>, %arg23: memref<128x128xbf16, #tpu.memory_space<vmem>>, %arg24: memref<1x128xf32, #tpu.memory_space<vmem>>, %arg25: memref<1x128xf32, #tpu.memory_space<vmem>>, %arg26: memref<1x128xf32, #tpu.memory_space<vmem>>, %arg27: memref<128x256xbf16, #tpu.memory_space<vmem>>, %arg28: memref<1x256xf32, #tpu.memory_space<vmem>>, %arg29: memref<256x128xbf16, #tpu.memory_space<vmem>>, %arg30: memref<1x128xf32, #tpu.memory_space<vmem>>, %arg31: memref<1x128xf32, #tpu.memory_space<vmem>>, %arg32: memref<1x128xf32, #tpu.memory_space<vmem>>, %arg33: memref<1x8x128xf32, #tpu.memory_space<vmem>>, %arg34: memref<8x128xbf16, #tpu.memory_space<vmem>>) attributes {dimension_semantics = [#tpu.dimension_semantics<parallel>], iteration_bounds = array<i64: 2>, scalar_prefetch = 0 : i64, scratch_operands = 1 : i64, tpu.core_type = #tpu.core_type<tc>, window_params = [{transform_indices = @transform_0, window_bounds = array<i64: 1, 8, 128>}, {transform_indices = @transform_1, window_bounds = array<i64: 1, 8, 128>}, {transform_indices = @transform_2, window_bounds = array<i64: 1, 1, 8>}, {transform_indices = @transform_3, window_bounds = array<i64: 1, 1, 8>}, {pipeline_mode = #tpu.pipeline_mode<synchronous>, transform_indices = @transform_4, window_bounds = array<i64: 1, 128>}, {pipeline_mode = #tpu.pipeline_mode<synchronous>, transform_indices = @transform_5, window_bounds = array<i64: 1, 128>}, {pipeline_mode = #tpu.pipeline_mode<synchronous>, transform_indices = @transform_6, window_bounds = array<i64: 128, 128>}, {pipeline_mode = #tpu.pipeline_mode<synchronous>, transform_indices = @transform_7, window_bounds = array<i64: 1, 128>}, {pipeline_mode = #tpu.pipeline_mode<synchronous>, transform_indices = @transform_8, window_bounds = array<i64: 128, 128>}, {pipeline_mode = #tpu.pipeline_mode<synchronous>, transform_indices = @transform_9, window_bounds = array<i64: 1, 128>}, {pipeline_mode = #tpu.pipeline_mode<synchronous>, transform_indices = @transform_10, window_bounds = array<i64: 128, 128>}, {pipeline_mode = #tpu.pipeline_mode<synchronous>, transform_indices = @transform_11, window_bounds = array<i64: 1, 128>}, {pipeline_mode = #tpu.pipeline_mode<synchronous>, transform_indices = @transform_12, window_bounds = array<i64: 128, 128>}, {pipeline_mode = #tpu.pipeline_mode<synchronous>, transform_indices = @transform_13, window_bounds = array<i64: 1, 128>}, {pipeline_mode = #tpu.pipeline_mode<synchronous>, transform_indices = @transform_14, window_bounds = array<i64: 1, 128>}, {pipeline_mode = #tpu.pipeline_mode<synchronous>, transform_indices = @transform_15, window_bounds = array<i64: 1, 128>}, {pipeline_mode = #tpu.pipeline_mode<synchronous>, transform_indices = @transform_16, window_bounds = array<i64: 128, 128>}, {pipeline_mode = #tpu.pipeline_mode<synchronous>, transform_indices = @transform_17, window_bounds = array<i64: 1, 128>}, {pipeline_mode = #tpu.pipeline_mode<synchronous>, transform_indices = @transform_18, window_bounds = array<i64: 128, 128>}, {pipeline_mode = #tpu.pipeline_mode<synchronous>, transform_indices = @transform_19, window_bounds = array<i64: 1, 128>}, {pipeline_mode = #tpu.pipeline_mode<synchronous>, transform_indices = @transform_20, window_bounds = array<i64: 128, 128>}, {pipeline_mode = #tpu.pipeline_mode<synchronous>, transform_indices = @transform_21, window_bounds = array<i64: 1, 128>}, {pipeline_mode = #tpu.pipeline_mode<synchronous>, transform_indices = @transform_22, window_bounds = array<i64: 128, 128>}, {pipeline_mode = #tpu.pipeline_mode<synchronous>, transform_indices = @transform_23, window_bounds = array<i64: 1, 128>}, {pipeline_mode = #tpu.pipeline_mode<synchronous>, transform_indices = @transform_24, window_bounds = array<i64: 1, 128>}, {pipeline_mode = #tpu.pipeline_mode<synchronous>, transform_indices = @transform_25, window_bounds = array<i64: 1, 128>}, {pipeline_mode = #tpu.pipeline_mode<synchronous>, transform_indices = @transform_26, window_bounds = array<i64: 128, 256>}, {pipeline_mode = #tpu.pipeline_mode<synchronous>, transform_indices = @transform_27, window_bounds = array<i64: 1, 256>}, {pipeline_mode = #tpu.pipeline_mode<synchronous>, transform_indices = @transform_28, window_bounds = array<i64: 256, 128>}, {pipeline_mode = #tpu.pipeline_mode<synchronous>, transform_indices = @transform_29, window_bounds = array<i64: 1, 128>}, {pipeline_mode = #tpu.pipeline_mode<synchronous>, transform_indices = @transform_30, window_bounds = array<i64: 1, 128>}, {pipeline_mode = #tpu.pipeline_mode<synchronous>, transform_indices = @transform_31, window_bounds = array<i64: 1, 128>}, {transform_indices = @transform_32, window_bounds = array<i64: 1, 8, 128>}]} {
    %c0 = arith.constant 0 : index
    %c0_0 = arith.constant 0 : index
    %c0_1 = arith.constant 0 : index
    %0 = vector.load %arg1[%c0, %c0_0, %c0_1] : memref<1x8x128xf32, #tpu.memory_space<vmem>>, vector<1x8x128xf32>
    %1 = vector.shape_cast %0 : vector<1x8x128xf32> to vector<8x128xf32>
    %c0_2 = arith.constant 0 : index
    %c0_3 = arith.constant 0 : index
    %c0_4 = arith.constant 0 : index
    %2 = vector.load %arg2[%c0_2, %c0_3, %c0_4] : memref<1x8x128xf32, #tpu.memory_space<vmem>>, vector<1x8x128xf32>
    %3 = vector.shape_cast %2 : vector<1x8x128xf32> to vector<8x128xf32>
    %4 = tpu.iota {dimensions = array<i32: 0>} : vector<8x8xi32>
    %5 = tpu.iota {dimensions = array<i32: 1>} : vector<8x8xi32>
    %6 = arith.cmpi sge, %4, %5 : vector<8x8xi32>
    %c0_5 = arith.constant 0 : index
    %c0_6 = arith.constant 0 : index
    %c0_7 = arith.constant 0 : index
    %7 = vector.load %arg3[%c0_5, %c0_6, %c0_7] : memref<1x1x8xi32, #tpu.memory_space<vmem>>, vector<1x1x8xi32>
    %8 = vector.shape_cast %7 : vector<1x1x8xi32> to vector<1x8xi32>
    %c0_i32 = arith.constant 0 : i32
    %9 = vector.broadcast %c0_i32 : i32 to vector<1x8xi32>
    %10 = arith.cmpi ne, %8, %9 : vector<1x8xi32>
    %11 = vector.broadcast %10 : vector<1x8xi1> to vector<8x8xi1>
    %12 = arith.andi %6, %11 : vector<8x8xi1>
    %cst = arith.constant 0.000000e+00 : f32
    %cst_8 = arith.constant -1.000000e+09 : f32
    %13 = vector.broadcast %cst : f32 to vector<8x8xf32>
    %14 = vector.broadcast %cst_8 : f32 to vector<8x8xf32>
    %15 = arith.select %12, %13, %14 : vector<8x8xi1>, vector<8x8xf32>
    %c0_9 = arith.constant 0 : index
    %c0_10 = arith.constant 0 : index
    %c0_11 = arith.constant 0 : index
    %16 = vector.load %arg4[%c0_9, %c0_10, %c0_11] : memref<1x1x8xi32, #tpu.memory_space<vmem>>, vector<1x1x8xi32>
    %17 = vector.shape_cast %16 : vector<1x1x8xi32> to vector<1x8xi32>
    %c0_i32_12 = arith.constant 0 : i32
    %18 = vector.broadcast %c0_i32_12 : i32 to vector<1x8xi32>
    %19 = arith.cmpi ne, %17, %18 : vector<1x8xi32>
    %cst_13 = arith.constant 0.000000e+00 : f32
    %cst_14 = arith.constant -1.000000e+09 : f32
    %20 = vector.broadcast %cst_13 : f32 to vector<1x8xf32>
    %21 = vector.broadcast %cst_14 : f32 to vector<1x8xf32>
    %22 = arith.select %19, %20, %21 : vector<1x8xi1>, vector<1x8xf32>
    %c0_15 = arith.constant 0 : index
    %c0_16 = arith.constant 0 : index
    %23 = vector.load %arg5[%c0_15, %c0_16] : memref<1x128xf32, #tpu.memory_space<vmem>>, vector<1x128xf32>
    %c0_17 = arith.constant 0 : index
    %c0_18 = arith.constant 0 : index
    %24 = vector.load %arg6[%c0_17, %c0_18] : memref<1x128xf32, #tpu.memory_space<vmem>>, vector<1x128xf32>
    %cst_19 = arith.constant dense<0.000000e+00> : vector<8xf32>
    %25 = vector.multi_reduction <add>, %1, %cst_19 [1] : vector<8x128xf32> to vector<8xf32>
    %26 = vector.shape_cast %25 : vector<8xf32> to vector<8x1xf32>
    %cst_20 = arith.constant 1.280000e+02 : f32
    %27 = vector.broadcast %cst_20 : f32 to vector<8x1xf32>
    %28 = arith.divf %26, %27 : vector<8x1xf32>
    %29 = vector.broadcast %28 : vector<8x1xf32> to vector<8x128xf32>
    %30 = arith.subf %1, %29 : vector<8x128xf32>
    %31 = arith.mulf %30, %30 : vector<8x128xf32>
    %cst_21 = arith.constant dense<0.000000e+00> : vector<8xf32>
    %32 = vector.multi_reduction <add>, %31, %cst_21 [1] : vector<8x128xf32> to vector<8xf32>
    %33 = vector.shape_cast %32 : vector<8xf32> to vector<8x1xf32>
    %cst_22 = arith.constant 0.00787401571 : f32
    %34 = vector.broadcast %cst_22 : f32 to vector<8x1xf32>
    %35 = arith.mulf %33, %34 : vector<8x1xf32>
    %36 = vector.broadcast %23 : vector<1x128xf32> to vector<8x128xf32>
    %37 = arith.mulf %36, %30 : vector<8x128xf32>
    %cst_23 = arith.constant 9.99999997E-7 : f32
    %38 = vector.broadcast %cst_23 : f32 to vector<8x1xf32>
    %39 = arith.addf %35, %38 : vector<8x1xf32>
    %40 = math.rsqrt %39 : vector<8x1xf32>
    %41 = vector.broadcast %40 : vector<8x1xf32> to vector<8x128xf32>
    %42 = arith.mulf %37, %41 : vector<8x128xf32>
    %43 = vector.broadcast %24 : vector<1x128xf32> to vector<8x128xf32>
    %44 = arith.addf %42, %43 : vector<8x128xf32>
    %45 = arith.truncf %44 : vector<8x128xf32> to vector<8x128xbf16>
    %46 = arith.truncf %44 : vector<8x128xf32> to vector<8x128xbf16>
    %c0_24 = arith.constant 0 : index
    %c0_25 = arith.constant 0 : index
    %47 = vector.load %arg7[%c0_24, %c0_25] : memref<128x128xbf16, #tpu.memory_space<vmem>>, vector<128x128xbf16>
    %cst_26 = arith.constant dense<0.000000e+00> : vector<8x128xf32>
    %48 = tpu.matmul %45, %47, %cst_26 {dimension_numbers = #tpu.dot_dimension_numbers<[1], [0], [0], [1], [0, 0, 1, 1], [], []>} : vector<8x128xbf16>, vector<128x128xbf16>, vector<8x128xf32> -> vector<8x128xf32>
    %c0_27 = arith.constant 0 : index
    %c0_28 = arith.constant 0 : index
    %49 = vector.load %arg8[%c0_27, %c0_28] : memref<1x128xf32, #tpu.memory_space<vmem>>, vector<1x128xf32>
    %50 = vector.broadcast %49 : vector<1x128xf32> to vector<8x128xf32>
    %51 = arith.addf %48, %50 : vector<8x128xf32>
    %c0_29 = arith.constant 0 : index
    %c0_30 = arith.constant 0 : index
    %52 = vector.load %arg9[%c0_29, %c0_30] : memref<128x128xbf16, #tpu.memory_space<vmem>>, vector<128x128xbf16>
    %cst_31 = arith.constant dense<0.000000e+00> : vector<8x128xf32>
    %53 = tpu.matmul %46, %52, %cst_31 {dimension_numbers = #tpu.dot_dimension_numbers<[1], [0], [0], [1], [0, 0, 1, 1], [], []>} : vector<8x128xbf16>, vector<128x128xbf16>, vector<8x128xf32> -> vector<8x128xf32>
    %c0_32 = arith.constant 0 : index
    %c0_33 = arith.constant 0 : index
    %54 = vector.load %arg10[%c0_32, %c0_33] : memref<1x128xf32, #tpu.memory_space<vmem>>, vector<1x128xf32>
    %55 = vector.broadcast %54 : vector<1x128xf32> to vector<8x128xf32>
    %56 = arith.addf %53, %55 : vector<8x128xf32>
    %c0_34 = arith.constant 0 : index
    %c0_35 = arith.constant 0 : index
    %57 = vector.load %arg11[%c0_34, %c0_35] : memref<128x128xbf16, #tpu.memory_space<vmem>>, vector<128x128xbf16>
    %cst_36 = arith.constant dense<0.000000e+00> : vector<8x128xf32>
    %58 = tpu.matmul %46, %57, %cst_36 {dimension_numbers = #tpu.dot_dimension_numbers<[1], [0], [0], [1], [0, 0, 1, 1], [], []>} : vector<8x128xbf16>, vector<128x128xbf16>, vector<8x128xf32> -> vector<8x128xf32>
    %c0_37 = arith.constant 0 : index
    %c0_38 = arith.constant 0 : index
    %59 = vector.load %arg12[%c0_37, %c0_38] : memref<1x128xf32, #tpu.memory_space<vmem>>, vector<1x128xf32>
    %60 = vector.broadcast %59 : vector<1x128xf32> to vector<8x128xf32>
    %61 = arith.addf %58, %60 : vector<8x128xf32>
    %cst_39 = arith.constant 0.176776692 : f32
    %62 = vector.broadcast %cst_39 : f32 to vector<8x128xf32>
    %63 = arith.mulf %51, %62 : vector<8x128xf32>
    %64 = arith.truncf %63 : vector<8x128xf32> to vector<8x128xbf16>
    %65 = arith.truncf %56 : vector<8x128xf32> to vector<8x128xbf16>
    %66 = arith.truncf %61 : vector<8x128xf32> to vector<8x128xbf16>
    %67 = vector.extract_strided_slice %64 {offsets = [0, 0], sizes = [8, 32], strides = [1, 1]} : vector<8x128xbf16> to vector<8x32xbf16>
    %68 = vector.extract_strided_slice %65 {offsets = [0, 0], sizes = [8, 32], strides = [1, 1]} : vector<8x128xbf16> to vector<8x32xbf16>
    %cst_40 = arith.constant dense<0.000000e+00> : vector<8x8xf32>
    %69 = tpu.matmul %67, %68, %cst_40 {dimension_numbers = #tpu.dot_dimension_numbers<[1], [1], [0], [0], [0, 0, 1, 0], [], []>} : vector<8x32xbf16>, vector<8x32xbf16>, vector<8x8xf32> -> vector<8x8xf32>
    %70 = arith.addf %69, %15 : vector<8x8xf32>
    %cst_41 = arith.constant dense<0xFF800000> : vector<8xf32>
    %71 = vector.multi_reduction <maximumf>, %70, %cst_41 [1] : vector<8x8xf32> to vector<8xf32>
    %72 = vector.shape_cast %71 : vector<8xf32> to vector<8x1xf32>
    %73 = vector.broadcast %72 : vector<8x1xf32> to vector<8x8xf32>
    %74 = arith.subf %70, %73 : vector<8x8xf32>
    %75 = math.exp %74 : vector<8x8xf32>
    %cst_42 = arith.constant dense<0.000000e+00> : vector<8xf32>
    %76 = vector.multi_reduction <add>, %75, %cst_42 [1] : vector<8x8xf32> to vector<8xf32>
    %77 = vector.shape_cast %76 : vector<8xf32> to vector<8x1xf32>
    %78 = tpu.reciprocal %77 {approx = true} : vector<8x1xf32> -> vector<8x1xf32>
    %79 = vector.broadcast %78 : vector<8x1xf32> to vector<8x8xf32>
    %80 = arith.mulf %75, %79 : vector<8x8xf32>
    %81 = arith.truncf %80 : vector<8x8xf32> to vector<8x8xbf16>
    %82 = vector.extract_strided_slice %66 {offsets = [0, 0], sizes = [8, 32], strides = [1, 1]} : vector<8x128xbf16> to vector<8x32xbf16>
    %cst_43 = arith.constant dense<0.000000e+00> : vector<8x32xf32>
    %83 = tpu.matmul %81, %82, %cst_43 {dimension_numbers = #tpu.dot_dimension_numbers<[1], [0], [0], [1], [0, 0, 1, 1], [], []>} : vector<8x8xbf16>, vector<8x32xbf16>, vector<8x32xf32> -> vector<8x32xf32>
    %84 = arith.truncf %83 : vector<8x32xf32> to vector<8x32xbf16>
    %c0_44 = arith.constant 0 : index
    %c0_45 = arith.constant 0 : index
    %85 = vector.load %arg34[%c0_44, %c0_45] : memref<8x128xbf16, #tpu.memory_space<vmem>>, vector<8x32xbf16>
    tpu.vector_store %arg34[%c0_44, %c0_45], %84 {strides = array<i32>} : memref<8x128xbf16, #tpu.memory_space<vmem>>, vector<8x32xbf16>,
    %86 = vector.extract_strided_slice %64 {offsets = [0, 32], sizes = [8, 32], strides = [1, 1]} : vector<8x128xbf16> to vector<8x32xbf16>
    %87 = vector.extract_strided_slice %65 {offsets = [0, 32], sizes = [8, 32], strides = [1, 1]} : vector<8x128xbf16> to vector<8x32xbf16>
    %cst_46 = arith.constant dense<0.000000e+00> : vector<8x8xf32>
    %88 = tpu.matmul %86, %87, %cst_46 {dimension_numbers = #tpu.dot_dimension_numbers<[1], [1], [0], [0], [0, 0, 1, 0], [], []>} : vector<8x32xbf16>, vector<8x32xbf16>, vector<8x8xf32> -> vector<8x8xf32>
    %89 = arith.addf %88, %15 : vector<8x8xf32>
    %cst_47 = arith.constant dense<0xFF800000> : vector<8xf32>
    %90 = vector.multi_reduction <maximumf>, %89, %cst_47 [1] : vector<8x8xf32> to vector<8xf32>
    %91 = vector.shape_cast %90 : vector<8xf32> to vector<8x1xf32>
    %92 = vector.broadcast %91 : vector<8x1xf32> to vector<8x8xf32>
    %93 = arith.subf %89, %92 : vector<8x8xf32>
    %94 = math.exp %93 : vector<8x8xf32>
    %cst_48 = arith.constant dense<0.000000e+00> : vector<8xf32>
    %95 = vector.multi_reduction <add>, %94, %cst_48 [1] : vector<8x8xf32> to vector<8xf32>
    %96 = vector.shape_cast %95 : vector<8xf32> to vector<8x1xf32>
    %97 = tpu.reciprocal %96 {approx = true} : vector<8x1xf32> -> vector<8x1xf32>
    %98 = vector.broadcast %97 : vector<8x1xf32> to vector<8x8xf32>
    %99 = arith.mulf %94, %98 : vector<8x8xf32>
    %100 = arith.truncf %99 : vector<8x8xf32> to vector<8x8xbf16>
    %101 = vector.extract_strided_slice %66 {offsets = [0, 32], sizes = [8, 32], strides = [1, 1]} : vector<8x128xbf16> to vector<8x32xbf16>
    %cst_49 = arith.constant dense<0.000000e+00> : vector<8x32xf32>
    %102 = tpu.matmul %100, %101, %cst_49 {dimension_numbers = #tpu.dot_dimension_numbers<[1], [0], [0], [1], [0, 0, 1, 1], [], []>} : vector<8x8xbf16>, vector<8x32xbf16>, vector<8x32xf32> -> vector<8x32xf32>
    %103 = arith.truncf %102 : vector<8x32xf32> to vector<8x32xbf16>
    %c0_50 = arith.constant 0 : index
    %c32 = arith.constant 32 : index
    %104 = vector.load %arg34[%c0_50, %c32] : memref<8x128xbf16, #tpu.memory_space<vmem>>, vector<8x32xbf16>
    tpu.vector_store %arg34[%c0_50, %c32], %103 {strides = array<i32>} : memref<8x128xbf16, #tpu.memory_space<vmem>>, vector<8x32xbf16>,
    %105 = vector.extract_strided_slice %64 {offsets = [0, 64], sizes = [8, 32], strides = [1, 1]} : vector<8x128xbf16> to vector<8x32xbf16>
    %106 = vector.extract_strided_slice %65 {offsets = [0, 64], sizes = [8, 32], strides = [1, 1]} : vector<8x128xbf16> to vector<8x32xbf16>
    %cst_51 = arith.constant dense<0.000000e+00> : vector<8x8xf32>
    %107 = tpu.matmul %105, %106, %cst_51 {dimension_numbers = #tpu.dot_dimension_numbers<[1], [1], [0], [0], [0, 0, 1, 0], [], []>} : vector<8x32xbf16>, vector<8x32xbf16>, vector<8x8xf32> -> vector<8x8xf32>
    %108 = arith.addf %107, %15 : vector<8x8xf32>
    %cst_52 = arith.constant dense<0xFF800000> : vector<8xf32>
    %109 = vector.multi_reduction <maximumf>, %108, %cst_52 [1] : vector<8x8xf32> to vector<8xf32>
    %110 = vector.shape_cast %109 : vector<8xf32> to vector<8x1xf32>
    %111 = vector.broadcast %110 : vector<8x1xf32> to vector<8x8xf32>
    %112 = arith.subf %108, %111 : vector<8x8xf32>
    %113 = math.exp %112 : vector<8x8xf32>
    %cst_53 = arith.constant dense<0.000000e+00> : vector<8xf32>
    %114 = vector.multi_reduction <add>, %113, %cst_53 [1] : vector<8x8xf32> to vector<8xf32>
    %115 = vector.shape_cast %114 : vector<8xf32> to vector<8x1xf32>
    %116 = tpu.reciprocal %115 {approx = true} : vector<8x1xf32> -> vector<8x1xf32>
    %117 = vector.broadcast %116 : vector<8x1xf32> to vector<8x8xf32>
    %118 = arith.mulf %113, %117 : vector<8x8xf32>
    %119 = arith.truncf %118 : vector<8x8xf32> to vector<8x8xbf16>
    %120 = vector.extract_strided_slice %66 {offsets = [0, 64], sizes = [8, 32], strides = [1, 1]} : vector<8x128xbf16> to vector<8x32xbf16>
    %cst_54 = arith.constant dense<0.000000e+00> : vector<8x32xf32>
    %121 = tpu.matmul %119, %120, %cst_54 {dimension_numbers = #tpu.dot_dimension_numbers<[1], [0], [0], [1], [0, 0, 1, 1], [], []>} : vector<8x8xbf16>, vector<8x32xbf16>, vector<8x32xf32> -> vector<8x32xf32>
    %122 = arith.truncf %121 : vector<8x32xf32> to vector<8x32xbf16>
    %c0_55 = arith.constant 0 : index
    %c64 = arith.constant 64 : index
    %123 = vector.load %arg34[%c0_55, %c64] : memref<8x128xbf16, #tpu.memory_space<vmem>>, vector<8x32xbf16>
    tpu.vector_store %arg34[%c0_55, %c64], %122 {strides = array<i32>} : memref<8x128xbf16, #tpu.memory_space<vmem>>, vector<8x32xbf16>,
    %124 = vector.extract_strided_slice %64 {offsets = [0, 96], sizes = [8, 32], strides = [1, 1]} : vector<8x128xbf16> to vector<8x32xbf16>
    %125 = vector.extract_strided_slice %65 {offsets = [0, 96], sizes = [8, 32], strides = [1, 1]} : vector<8x128xbf16> to vector<8x32xbf16>
    %cst_56 = arith.constant dense<0.000000e+00> : vector<8x8xf32>
    %126 = tpu.matmul %124, %125, %cst_56 {dimension_numbers = #tpu.dot_dimension_numbers<[1], [1], [0], [0], [0, 0, 1, 0], [], []>} : vector<8x32xbf16>, vector<8x32xbf16>, vector<8x8xf32> -> vector<8x8xf32>
    %127 = arith.addf %126, %15 : vector<8x8xf32>
    %cst_57 = arith.constant dense<0xFF800000> : vector<8xf32>
    %128 = vector.multi_reduction <maximumf>, %127, %cst_57 [1] : vector<8x8xf32> to vector<8xf32>
    %129 = vector.shape_cast %128 : vector<8xf32> to vector<8x1xf32>
    %130 = vector.broadcast %129 : vector<8x1xf32> to vector<8x8xf32>
    %131 = arith.subf %127, %130 : vector<8x8xf32>
    %132 = math.exp %131 : vector<8x8xf32>
    %cst_58 = arith.constant dense<0.000000e+00> : vector<8xf32>
    %133 = vector.multi_reduction <add>, %132, %cst_58 [1] : vector<8x8xf32> to vector<8xf32>
    %134 = vector.shape_cast %133 : vector<8xf32> to vector<8x1xf32>
    %135 = tpu.reciprocal %134 {approx = true} : vector<8x1xf32> -> vector<8x1xf32>
    %136 = vector.broadcast %135 : vector<8x1xf32> to vector<8x8xf32>
    %137 = arith.mulf %132, %136 : vector<8x8xf32>
    %138 = arith.truncf %137 : vector<8x8xf32> to vector<8x8xbf16>
    %139 = vector.extract_strided_slice %66 {offsets = [0, 96], sizes = [8, 32], strides = [1, 1]} : vector<8x128xbf16> to vector<8x32xbf16>
    %cst_59 = arith.constant dense<0.000000e+00> : vector<8x32xf32>
    %140 = tpu.matmul %138, %139, %cst_59 {dimension_numbers = #tpu.dot_dimension_numbers<[1], [0], [0], [1], [0, 0, 1, 1], [], []>} : vector<8x8xbf16>, vector<8x32xbf16>, vector<8x32xf32> -> vector<8x32xf32>
    %141 = arith.truncf %140 : vector<8x32xf32> to vector<8x32xbf16>
    %c0_60 = arith.constant 0 : index
    %c96 = arith.constant 96 : index
    %142 = vector.load %arg34[%c0_60, %c96] : memref<8x128xbf16, #tpu.memory_space<vmem>>, vector<8x32xbf16>
    tpu.vector_store %arg34[%c0_60, %c96], %141 {strides = array<i32>} : memref<8x128xbf16, #tpu.memory_space<vmem>>, vector<8x32xbf16>,
    %c0_61 = arith.constant 0 : index
    %c0_62 = arith.constant 0 : index
    %143 = vector.load %arg34[%c0_61, %c0_62] : memref<8x128xbf16, #tpu.memory_space<vmem>>, vector<8x128xbf16>
    %c0_63 = arith.constant 0 : index
    %c0_64 = arith.constant 0 : index
    %144 = vector.load %arg13[%c0_63, %c0_64] : memref<128x128xbf16, #tpu.memory_space<vmem>>, vector<128x128xbf16>
    %cst_65 = arith.constant dense<0.000000e+00> : vector<8x128xf32>
    %145 = tpu.matmul %143, %144, %cst_65 {dimension_numbers = #tpu.dot_dimension_numbers<[1], [0], [0], [1], [0, 0, 1, 1], [], []>} : vector<8x128xbf16>, vector<128x128xbf16>, vector<8x128xf32> -> vector<8x128xf32>
    %c0_66 = arith.constant 0 : index
    %c0_67 = arith.constant 0 : index
    %146 = vector.load %arg14[%c0_66, %c0_67] : memref<1x128xf32, #tpu.memory_space<vmem>>, vector<1x128xf32>
    %147 = vector.broadcast %146 : vector<1x128xf32> to vector<8x128xf32>
    %148 = arith.addf %145, %147 : vector<8x128xf32>
    %149 = arith.addf %1, %148 : vector<8x128xf32>
    %c0_68 = arith.constant 0 : index
    %c0_69 = arith.constant 0 : index
    %150 = vector.load %arg15[%c0_68, %c0_69] : memref<1x128xf32, #tpu.memory_space<vmem>>, vector<1x128xf32>
    %c0_70 = arith.constant 0 : index
    %c0_71 = arith.constant 0 : index
    %151 = vector.load %arg16[%c0_70, %c0_71] : memref<1x128xf32, #tpu.memory_space<vmem>>, vector<1x128xf32>
    %cst_72 = arith.constant dense<0.000000e+00> : vector<8xf32>
    %152 = vector.multi_reduction <add>, %149, %cst_72 [1] : vector<8x128xf32> to vector<8xf32>
    %153 = vector.shape_cast %152 : vector<8xf32> to vector<8x1xf32>
    %cst_73 = arith.constant 1.280000e+02 : f32
    %154 = vector.broadcast %cst_73 : f32 to vector<8x1xf32>
    %155 = arith.divf %153, %154 : vector<8x1xf32>
    %156 = vector.broadcast %155 : vector<8x1xf32> to vector<8x128xf32>
    %157 = arith.subf %149, %156 : vector<8x128xf32>
    %158 = arith.mulf %157, %157 : vector<8x128xf32>
    %cst_74 = arith.constant dense<0.000000e+00> : vector<8xf32>
    %159 = vector.multi_reduction <add>, %158, %cst_74 [1] : vector<8x128xf32> to vector<8xf32>
    %160 = vector.shape_cast %159 : vector<8xf32> to vector<8x1xf32>
    %cst_75 = arith.constant 0.00787401571 : f32
    %161 = vector.broadcast %cst_75 : f32 to vector<8x1xf32>
    %162 = arith.mulf %160, %161 : vector<8x1xf32>
    %163 = vector.broadcast %150 : vector<1x128xf32> to vector<8x128xf32>
    %164 = arith.mulf %163, %157 : vector<8x128xf32>
    %cst_76 = arith.constant 9.99999997E-7 : f32
    %165 = vector.broadcast %cst_76 : f32 to vector<8x1xf32>
    %166 = arith.addf %162, %165 : vector<8x1xf32>
    %167 = math.rsqrt %166 : vector<8x1xf32>
    %168 = vector.broadcast %167 : vector<8x1xf32> to vector<8x128xf32>
    %169 = arith.mulf %164, %168 : vector<8x128xf32>
    %170 = vector.broadcast %151 : vector<1x128xf32> to vector<8x128xf32>
    %171 = arith.addf %169, %170 : vector<8x128xf32>
    %172 = arith.truncf %171 : vector<8x128xf32> to vector<8x128xbf16>
    %173 = arith.truncf %3 : vector<8x128xf32> to vector<8x128xbf16>
    %c0_77 = arith.constant 0 : index
    %c0_78 = arith.constant 0 : index
    %174 = vector.load %arg17[%c0_77, %c0_78] : memref<128x128xbf16, #tpu.memory_space<vmem>>, vector<128x128xbf16>
    %cst_79 = arith.constant dense<0.000000e+00> : vector<8x128xf32>
    %175 = tpu.matmul %172, %174, %cst_79 {dimension_numbers = #tpu.dot_dimension_numbers<[1], [0], [0], [1], [0, 0, 1, 1], [], []>} : vector<8x128xbf16>, vector<128x128xbf16>, vector<8x128xf32> -> vector<8x128xf32>
    %c0_80 = arith.constant 0 : index
    %c0_81 = arith.constant 0 : index
    %176 = vector.load %arg18[%c0_80, %c0_81] : memref<1x128xf32, #tpu.memory_space<vmem>>, vector<1x128xf32>
    %177 = vector.broadcast %176 : vector<1x128xf32> to vector<8x128xf32>
    %178 = arith.addf %175, %177 : vector<8x128xf32>
    %c0_82 = arith.constant 0 : index
    %c0_83 = arith.constant 0 : index
    %179 = vector.load %arg19[%c0_82, %c0_83] : memref<128x128xbf16, #tpu.memory_space<vmem>>, vector<128x128xbf16>
    %cst_84 = arith.constant dense<0.000000e+00> : vector<8x128xf32>
    %180 = tpu.matmul %173, %179, %cst_84 {dimension_numbers = #tpu.dot_dimension_numbers<[1], [0], [0], [1], [0, 0, 1, 1], [], []>} : vector<8x128xbf16>, vector<128x128xbf16>, vector<8x128xf32> -> vector<8x128xf32>
    %c0_85 = arith.constant 0 : index
    %c0_86 = arith.constant 0 : index
    %181 = vector.load %arg20[%c0_85, %c0_86] : memref<1x128xf32, #tpu.memory_space<vmem>>, vector<1x128xf32>
    %182 = vector.broadcast %181 : vector<1x128xf32> to vector<8x128xf32>
    %183 = arith.addf %180, %182 : vector<8x128xf32>
    %c0_87 = arith.constant 0 : index
    %c0_88 = arith.constant 0 : index
    %184 = vector.load %arg21[%c0_87, %c0_88] : memref<128x128xbf16, #tpu.memory_space<vmem>>, vector<128x128xbf16>
    %cst_89 = arith.constant dense<0.000000e+00> : vector<8x128xf32>
    %185 = tpu.matmul %173, %184, %cst_89 {dimension_numbers = #tpu.dot_dimension_numbers<[1], [0], [0], [1], [0, 0, 1, 1], [], []>} : vector<8x128xbf16>, vector<128x128xbf16>, vector<8x128xf32> -> vector<8x128xf32>
    %c0_90 = arith.constant 0 : index
    %c0_91 = arith.constant 0 : index
    %186 = vector.load %arg22[%c0_90, %c0_91] : memref<1x128xf32, #tpu.memory_space<vmem>>, vector<1x128xf32>
    %187 = vector.broadcast %186 : vector<1x128xf32> to vector<8x128xf32>
    %188 = arith.addf %185, %187 : vector<8x128xf32>
    %cst_92 = arith.constant 0.176776692 : f32
    %189 = vector.broadcast %cst_92 : f32 to vector<8x128xf32>
    %190 = arith.mulf %178, %189 : vector<8x128xf32>
    %191 = arith.truncf %190 : vector<8x128xf32> to vector<8x128xbf16>
    %192 = arith.truncf %183 : vector<8x128xf32> to vector<8x128xbf16>
    %193 = arith.truncf %188 : vector<8x128xf32> to vector<8x128xbf16>
    %194 = vector.extract_strided_slice %191 {offsets = [0, 0], sizes = [8, 32], strides = [1, 1]} : vector<8x128xbf16> to vector<8x32xbf16>
    %195 = vector.extract_strided_slice %192 {offsets = [0, 0], sizes = [8, 32], strides = [1, 1]} : vector<8x128xbf16> to vector<8x32xbf16>
    %cst_93 = arith.constant dense<0.000000e+00> : vector<8x8xf32>
    %196 = tpu.matmul %194, %195, %cst_93 {dimension_numbers = #tpu.dot_dimension_numbers<[1], [1], [0], [0], [0, 0, 1, 0], [], []>} : vector<8x32xbf16>, vector<8x32xbf16>, vector<8x8xf32> -> vector<8x8xf32>
    %197 = vector.broadcast %22 : vector<1x8xf32> to vector<8x8xf32>
    %198 = arith.addf %196, %197 : vector<8x8xf32>
    %cst_94 = arith.constant dense<0xFF800000> : vector<8xf32>
    %199 = vector.multi_reduction <maximumf>, %198, %cst_94 [1] : vector<8x8xf32> to vector<8xf32>
    %200 = vector.shape_cast %199 : vector<8xf32> to vector<8x1xf32>
    %201 = vector.broadcast %200 : vector<8x1xf32> to vector<8x8xf32>
    %202 = arith.subf %198, %201 : vector<8x8xf32>
    %203 = math.exp %202 : vector<8x8xf32>
    %cst_95 = arith.constant dense<0.000000e+00> : vector<8xf32>
    %204 = vector.multi_reduction <add>, %203, %cst_95 [1] : vector<8x8xf32> to vector<8xf32>
    %205 = vector.shape_cast %204 : vector<8xf32> to vector<8x1xf32>
    %206 = tpu.reciprocal %205 {approx = true} : vector<8x1xf32> -> vector<8x1xf32>
    %207 = vector.broadcast %206 : vector<8x1xf32> to vector<8x8xf32>
    %208 = arith.mulf %203, %207 : vector<8x8xf32>
    %209 = arith.truncf %208 : vector<8x8xf32> to vector<8x8xbf16>
    %210 = vector.extract_strided_slice %193 {offsets = [0, 0], sizes = [8, 32], strides = [1, 1]} : vector<8x128xbf16> to vector<8x32xbf16>
    %cst_96 = arith.constant dense<0.000000e+00> : vector<8x32xf32>
    %211 = tpu.matmul %209, %210, %cst_96 {dimension_numbers = #tpu.dot_dimension_numbers<[1], [0], [0], [1], [0, 0, 1, 1], [], []>} : vector<8x8xbf16>, vector<8x32xbf16>, vector<8x32xf32> -> vector<8x32xf32>
    %212 = arith.truncf %211 : vector<8x32xf32> to vector<8x32xbf16>
    %c0_97 = arith.constant 0 : index
    %c0_98 = arith.constant 0 : index
    %213 = vector.load %arg34[%c0_97, %c0_98] : memref<8x128xbf16, #tpu.memory_space<vmem>>, vector<8x32xbf16>
    tpu.vector_store %arg34[%c0_97, %c0_98], %212 {strides = array<i32>} : memref<8x128xbf16, #tpu.memory_space<vmem>>, vector<8x32xbf16>,
    %214 = vector.extract_strided_slice %191 {offsets = [0, 32], sizes = [8, 32], strides = [1, 1]} : vector<8x128xbf16> to vector<8x32xbf16>
    %215 = vector.extract_strided_slice %192 {offsets = [0, 32], sizes = [8, 32], strides = [1, 1]} : vector<8x128xbf16> to vector<8x32xbf16>
    %cst_99 = arith.constant dense<0.000000e+00> : vector<8x8xf32>
    %216 = tpu.matmul %214, %215, %cst_99 {dimension_numbers = #tpu.dot_dimension_numbers<[1], [1], [0], [0], [0, 0, 1, 0], [], []>} : vector<8x32xbf16>, vector<8x32xbf16>, vector<8x8xf32> -> vector<8x8xf32>
    %217 = vector.broadcast %22 : vector<1x8xf32> to vector<8x8xf32>
    %218 = arith.addf %216, %217 : vector<8x8xf32>
    %cst_100 = arith.constant dense<0xFF800000> : vector<8xf32>
    %219 = vector.multi_reduction <maximumf>, %218, %cst_100 [1] : vector<8x8xf32> to vector<8xf32>
    %220 = vector.shape_cast %219 : vector<8xf32> to vector<8x1xf32>
    %221 = vector.broadcast %220 : vector<8x1xf32> to vector<8x8xf32>
    %222 = arith.subf %218, %221 : vector<8x8xf32>
    %223 = math.exp %222 : vector<8x8xf32>
    %cst_101 = arith.constant dense<0.000000e+00> : vector<8xf32>
    %224 = vector.multi_reduction <add>, %223, %cst_101 [1] : vector<8x8xf32> to vector<8xf32>
    %225 = vector.shape_cast %224 : vector<8xf32> to vector<8x1xf32>
    %226 = tpu.reciprocal %225 {approx = true} : vector<8x1xf32> -> vector<8x1xf32>
    %227 = vector.broadcast %226 : vector<8x1xf32> to vector<8x8xf32>
    %228 = arith.mulf %223, %227 : vector<8x8xf32>
    %229 = arith.truncf %228 : vector<8x8xf32> to vector<8x8xbf16>
    %230 = vector.extract_strided_slice %193 {offsets = [0, 32], sizes = [8, 32], strides = [1, 1]} : vector<8x128xbf16> to vector<8x32xbf16>
    %cst_102 = arith.constant dense<0.000000e+00> : vector<8x32xf32>
    %231 = tpu.matmul %229, %230, %cst_102 {dimension_numbers = #tpu.dot_dimension_numbers<[1], [0], [0], [1], [0, 0, 1, 1], [], []>} : vector<8x8xbf16>, vector<8x32xbf16>, vector<8x32xf32> -> vector<8x32xf32>
    %232 = arith.truncf %231 : vector<8x32xf32> to vector<8x32xbf16>
    %c0_103 = arith.constant 0 : index
    %c32_104 = arith.constant 32 : index
    %233 = vector.load %arg34[%c0_103, %c32_104] : memref<8x128xbf16, #tpu.memory_space<vmem>>, vector<8x32xbf16>
    tpu.vector_store %arg34[%c0_103, %c32_104], %232 {strides = array<i32>} : memref<8x128xbf16, #tpu.memory_space<vmem>>, vector<8x32xbf16>,
    %234 = vector.extract_strided_slice %191 {offsets = [0, 64], sizes = [8, 32], strides = [1, 1]} : vector<8x128xbf16> to vector<8x32xbf16>
    %235 = vector.extract_strided_slice %192 {offsets = [0, 64], sizes = [8, 32], strides = [1, 1]} : vector<8x128xbf16> to vector<8x32xbf16>
    %cst_105 = arith.constant dense<0.000000e+00> : vector<8x8xf32>
    %236 = tpu.matmul %234, %235, %cst_105 {dimension_numbers = #tpu.dot_dimension_numbers<[1], [1], [0], [0], [0, 0, 1, 0], [], []>} : vector<8x32xbf16>, vector<8x32xbf16>, vector<8x8xf32> -> vector<8x8xf32>
    %237 = vector.broadcast %22 : vector<1x8xf32> to vector<8x8xf32>
    %238 = arith.addf %236, %237 : vector<8x8xf32>
    %cst_106 = arith.constant dense<0xFF800000> : vector<8xf32>
    %239 = vector.multi_reduction <maximumf>, %238, %cst_106 [1] : vector<8x8xf32> to vector<8xf32>
    %240 = vector.shape_cast %239 : vector<8xf32> to vector<8x1xf32>
    %241 = vector.broadcast %240 : vector<8x1xf32> to vector<8x8xf32>
    %242 = arith.subf %238, %241 : vector<8x8xf32>
    %243 = math.exp %242 : vector<8x8xf32>
    %cst_107 = arith.constant dense<0.000000e+00> : vector<8xf32>
    %244 = vector.multi_reduction <add>, %243, %cst_107 [1] : vector<8x8xf32> to vector<8xf32>
    %245 = vector.shape_cast %244 : vector<8xf32> to vector<8x1xf32>
    %246 = tpu.reciprocal %245 {approx = true} : vector<8x1xf32> -> vector<8x1xf32>
    %247 = vector.broadcast %246 : vector<8x1xf32> to vector<8x8xf32>
    %248 = arith.mulf %243, %247 : vector<8x8xf32>
    %249 = arith.truncf %248 : vector<8x8xf32> to vector<8x8xbf16>
    %250 = vector.extract_strided_slice %193 {offsets = [0, 64], sizes = [8, 32], strides = [1, 1]} : vector<8x128xbf16> to vector<8x32xbf16>
    %cst_108 = arith.constant dense<0.000000e+00> : vector<8x32xf32>
    %251 = tpu.matmul %249, %250, %cst_108 {dimension_numbers = #tpu.dot_dimension_numbers<[1], [0], [0], [1], [0, 0, 1, 1], [], []>} : vector<8x8xbf16>, vector<8x32xbf16>, vector<8x32xf32> -> vector<8x32xf32>
    %252 = arith.truncf %251 : vector<8x32xf32> to vector<8x32xbf16>
    %c0_109 = arith.constant 0 : index
    %c64_110 = arith.constant 64 : index
    %253 = vector.load %arg34[%c0_109, %c64_110] : memref<8x128xbf16, #tpu.memory_space<vmem>>, vector<8x32xbf16>
    tpu.vector_store %arg34[%c0_109, %c64_110], %252 {strides = array<i32>} : memref<8x128xbf16, #tpu.memory_space<vmem>>, vector<8x32xbf16>,
    %254 = vector.extract_strided_slice %191 {offsets = [0, 96], sizes = [8, 32], strides = [1, 1]} : vector<8x128xbf16> to vector<8x32xbf16>
    %255 = vector.extract_strided_slice %192 {offsets = [0, 96], sizes = [8, 32], strides = [1, 1]} : vector<8x128xbf16> to vector<8x32xbf16>
    %cst_111 = arith.constant dense<0.000000e+00> : vector<8x8xf32>
    %256 = tpu.matmul %254, %255, %cst_111 {dimension_numbers = #tpu.dot_dimension_numbers<[1], [1], [0], [0], [0, 0, 1, 0], [], []>} : vector<8x32xbf16>, vector<8x32xbf16>, vector<8x8xf32> -> vector<8x8xf32>
    %257 = vector.broadcast %22 : vector<1x8xf32> to vector<8x8xf32>
    %258 = arith.addf %256, %257 : vector<8x8xf32>
    %cst_112 = arith.constant dense<0xFF800000> : vector<8xf32>
    %259 = vector.multi_reduction <maximumf>, %258, %cst_112 [1] : vector<8x8xf32> to vector<8xf32>
    %260 = vector.shape_cast %259 : vector<8xf32> to vector<8x1xf32>
    %261 = vector.broadcast %260 : vector<8x1xf32> to vector<8x8xf32>
    %262 = arith.subf %258, %261 : vector<8x8xf32>
    %263 = math.exp %262 : vector<8x8xf32>
    %cst_113 = arith.constant dense<0.000000e+00> : vector<8xf32>
    %264 = vector.multi_reduction <add>, %263, %cst_113 [1] : vector<8x8xf32> to vector<8xf32>
    %265 = vector.shape_cast %264 : vector<8xf32> to vector<8x1xf32>
    %266 = tpu.reciprocal %265 {approx = true} : vector<8x1xf32> -> vector<8x1xf32>
    %267 = vector.broadcast %266 : vector<8x1xf32> to vector<8x8xf32>
    %268 = arith.mulf %263, %267 : vector<8x8xf32>
    %269 = arith.truncf %268 : vector<8x8xf32> to vector<8x8xbf16>
    %270 = vector.extract_strided_slice %193 {offsets = [0, 96], sizes = [8, 32], strides = [1, 1]} : vector<8x128xbf16> to vector<8x32xbf16>
    %cst_114 = arith.constant dense<0.000000e+00> : vector<8x32xf32>
    %271 = tpu.matmul %269, %270, %cst_114 {dimension_numbers = #tpu.dot_dimension_numbers<[1], [0], [0], [1], [0, 0, 1, 1], [], []>} : vector<8x8xbf16>, vector<8x32xbf16>, vector<8x32xf32> -> vector<8x32xf32>
    %272 = arith.truncf %271 : vector<8x32xf32> to vector<8x32xbf16>
    %c0_115 = arith.constant 0 : index
    %c96_116 = arith.constant 96 : index
    %273 = vector.load %arg34[%c0_115, %c96_116] : memref<8x128xbf16, #tpu.memory_space<vmem>>, vector<8x32xbf16>
    tpu.vector_store %arg34[%c0_115, %c96_116], %272 {strides = array<i32>} : memref<8x128xbf16, #tpu.memory_space<vmem>>, vector<8x32xbf16>,
    %c0_117 = arith.constant 0 : index
    %c0_118 = arith.constant 0 : index
    %274 = vector.load %arg34[%c0_117, %c0_118] : memref<8x128xbf16, #tpu.memory_space<vmem>>, vector<8x128xbf16>
    %c0_119 = arith.constant 0 : index
    %c0_120 = arith.constant 0 : index
    %275 = vector.load %arg23[%c0_119, %c0_120] : memref<128x128xbf16, #tpu.memory_space<vmem>>, vector<128x128xbf16>
    %cst_121 = arith.constant dense<0.000000e+00> : vector<8x128xf32>
    %276 = tpu.matmul %274, %275, %cst_121 {dimension_numbers = #tpu.dot_dimension_numbers<[1], [0], [0], [1], [0, 0, 1, 1], [], []>} : vector<8x128xbf16>, vector<128x128xbf16>, vector<8x128xf32> -> vector<8x128xf32>
    %c0_122 = arith.constant 0 : index
    %c0_123 = arith.constant 0 : index
    %277 = vector.load %arg24[%c0_122, %c0_123] : memref<1x128xf32, #tpu.memory_space<vmem>>, vector<1x128xf32>
    %278 = vector.broadcast %277 : vector<1x128xf32> to vector<8x128xf32>
    %279 = arith.addf %276, %278 : vector<8x128xf32>
    %280 = arith.addf %149, %279 : vector<8x128xf32>
    %c0_124 = arith.constant 0 : index
    %c0_125 = arith.constant 0 : index
    %281 = vector.load %arg25[%c0_124, %c0_125] : memref<1x128xf32, #tpu.memory_space<vmem>>, vector<1x128xf32>
    %c0_126 = arith.constant 0 : index
    %c0_127 = arith.constant 0 : index
    %282 = vector.load %arg26[%c0_126, %c0_127] : memref<1x128xf32, #tpu.memory_space<vmem>>, vector<1x128xf32>
    %cst_128 = arith.constant dense<0.000000e+00> : vector<8xf32>
    %283 = vector.multi_reduction <add>, %280, %cst_128 [1] : vector<8x128xf32> to vector<8xf32>
    %284 = vector.shape_cast %283 : vector<8xf32> to vector<8x1xf32>
    %cst_129 = arith.constant 1.280000e+02 : f32
    %285 = vector.broadcast %cst_129 : f32 to vector<8x1xf32>
    %286 = arith.divf %284, %285 : vector<8x1xf32>
    %287 = vector.broadcast %286 : vector<8x1xf32> to vector<8x128xf32>
    %288 = arith.subf %280, %287 : vector<8x128xf32>
    %289 = arith.mulf %288, %288 : vector<8x128xf32>
    %cst_130 = arith.constant dense<0.000000e+00> : vector<8xf32>
    %290 = vector.multi_reduction <add>, %289, %cst_130 [1] : vector<8x128xf32> to vector<8xf32>
    %291 = vector.shape_cast %290 : vector<8xf32> to vector<8x1xf32>
    %cst_131 = arith.constant 0.00787401571 : f32
    %292 = vector.broadcast %cst_131 : f32 to vector<8x1xf32>
    %293 = arith.mulf %291, %292 : vector<8x1xf32>
    %294 = vector.broadcast %281 : vector<1x128xf32> to vector<8x128xf32>
    %295 = arith.mulf %294, %288 : vector<8x128xf32>
    %cst_132 = arith.constant 9.99999997E-7 : f32
    %296 = vector.broadcast %cst_132 : f32 to vector<8x1xf32>
    %297 = arith.addf %293, %296 : vector<8x1xf32>
    %298 = math.rsqrt %297 : vector<8x1xf32>
    %299 = vector.broadcast %298 : vector<8x1xf32> to vector<8x128xf32>
    %300 = arith.mulf %295, %299 : vector<8x128xf32>
    %301 = vector.broadcast %282 : vector<1x128xf32> to vector<8x128xf32>
    %302 = arith.addf %300, %301 : vector<8x128xf32>
    %303 = arith.truncf %302 : vector<8x128xf32> to vector<8x128xbf16>
    %c0_133 = arith.constant 0 : index
    %c0_134 = arith.constant 0 : index
    %304 = vector.load %arg27[%c0_133, %c0_134] : memref<128x256xbf16, #tpu.memory_space<vmem>>, vector<128x256xbf16>
    %cst_135 = arith.constant dense<0.000000e+00> : vector<8x256xf32>
    %305 = tpu.matmul %303, %304, %cst_135 {dimension_numbers = #tpu.dot_dimension_numbers<[1], [0], [0], [1], [0, 0, 1, 1], [], []>} : vector<8x128xbf16>, vector<128x256xbf16>, vector<8x256xf32> -> vector<8x256xf32>
    %c0_136 = arith.constant 0 : index
    %c0_137 = arith.constant 0 : index
    %306 = vector.load %arg28[%c0_136, %c0_137] : memref<1x256xf32, #tpu.memory_space<vmem>>, vector<1x256xf32>
    %307 = vector.broadcast %306 : vector<1x256xf32> to vector<8x256xf32>
    %308 = arith.addf %305, %307 : vector<8x256xf32>
    %cst_138 = arith.constant 0.000000e+00 : f32
    %309 = vector.broadcast %cst_138 : f32 to vector<8x256xf32>
    %310 = arith.maximumf %308, %309 : vector<8x256xf32>
    %311 = arith.truncf %310 : vector<8x256xf32> to vector<8x256xbf16>
    %c0_139 = arith.constant 0 : index
    %c0_140 = arith.constant 0 : index
    %312 = vector.load %arg29[%c0_139, %c0_140] : memref<256x128xbf16, #tpu.memory_space<vmem>>, vector<256x128xbf16>
    %cst_141 = arith.constant dense<0.000000e+00> : vector<8x128xf32>
    %313 = tpu.matmul %311, %312, %cst_141 {dimension_numbers = #tpu.dot_dimension_numbers<[1], [0], [0], [1], [0, 0, 1, 1], [], []>} : vector<8x256xbf16>, vector<256x128xbf16>, vector<8x128xf32> -> vector<8x128xf32>
    %c0_142 = arith.constant 0 : index
    %c0_143 = arith.constant 0 : index
    %314 = vector.load %arg30[%c0_142, %c0_143] : memref<1x128xf32, #tpu.memory_space<vmem>>, vector<1x128xf32>
    %315 = vector.broadcast %314 : vector<1x128xf32> to vector<8x128xf32>
    %316 = arith.addf %313, %315 : vector<8x128xf32>
    %317 = arith.addf %280, %316 : vector<8x128xf32>
    %c0_144 = arith.constant 0 : index
    %c0_145 = arith.constant 0 : index
    %c0_146 = arith.constant 0 : index
    %318 = vector.load %arg33[%c0_144, %c0_145, %c0_146] : memref<1x8x128xf32, #tpu.memory_space<vmem>>, vector<1x8x128xf32>
    %319 = vector.shape_cast %318 : vector<1x8x128xf32> to vector<8x128xf32>
    %320 = vector.shape_cast %317 : vector<8x128xf32> to vector<1x8x128xf32>
    tpu.vector_store %arg33[%c0_144, %c0_145, %c0_146], %320 {strides = array<i32>} : memref<1x8x128xf32, #tpu.memory_space<vmem>>, vector<1x8x128xf32>,
    return
  }
  func.func @transform_0(%arg0: i32) -> (i32, i32, i32) {
    %c0_i32 = arith.constant 0 : i32
    %c0_i32_0 = arith.constant 0 : i32
    %c0_i32_1 = arith.constant 0 : i32
    return %arg0, %c0_i32, %c0_i32_0 : i32, i32, i32
  }
  func.func @transform_1(%arg0: i32) -> (i32, i32, i32) {
    %c0_i32 = arith.constant 0 : i32
    %c0_i32_0 = arith.constant 0 : i32
    %c0_i32_1 = arith.constant 0 : i32
    return %arg0, %c0_i32, %c0_i32_0 : i32, i32, i32
  }
  func.func @transform_2(%arg0: i32) -> (i32, i32, i32) {
    %c0_i32 = arith.constant 0 : i32
    %c0_i32_0 = arith.constant 0 : i32
    %c0_i32_1 = arith.constant 0 : i32
    return %arg0, %c0_i32, %c0_i32_0 : i32, i32, i32
  }
  func.func @transform_3(%arg0: i32) -> (i32, i32, i32) {
    %c0_i32 = arith.constant 0 : i32
    %c0_i32_0 = arith.constant 0 : i32
    %c0_i32_1 = arith.constant 0 : i32
    return %arg0, %c0_i32, %c0_i32_0 : i32, i32, i32
  }
  func.func @transform_4(%arg0: i32) -> (i32, i32) {
    %c0_i32 = arith.constant 0 : i32
    %c0_i32_0 = arith.constant 0 : i32
    %c0_i32_1 = arith.constant 0 : i32
    return %c0_i32, %c0_i32_0 : i32, i32
  }
  func.func @transform_5(%arg0: i32) -> (i32, i32) {
    %c0_i32 = arith.constant 0 : i32
    %c0_i32_0 = arith.constant 0 : i32
    %c0_i32_1 = arith.constant 0 : i32
    return %c0_i32, %c0_i32_0 : i32, i32
  }
  func.func @transform_6(%arg0: i32) -> (i32, i32) {
    %c0_i32 = arith.constant 0 : i32
    %c0_i32_0 = arith.constant 0 : i32
    %c0_i32_1 = arith.constant 0 : i32
    return %c0_i32, %c0_i32_0 : i32, i32
  }
  func.func @transform_7(%arg0: i32) -> (i32, i32) {
    %c0_i32 = arith.constant 0 : i32
    %c0_i32_0 = arith.constant 0 : i32
    %c0_i32_1 = arith.constant 0 : i32
    return %c0_i32, %c0_i32_0 : i32, i32
  }
  func.func @transform_8(%arg0: i32) -> (i32, i32) {
    %c0_i32 = arith.constant 0 : i32
    %c0_i32_0 = arith.constant 0 : i32
    %c0_i32_1 = arith.constant 0 : i32
    return %c0_i32, %c0_i32_0 : i32, i32
  }
  func.func @transform_9(%arg0: i32) -> (i32, i32) {
    %c0_i32 = arith.constant 0 : i32
    %c0_i32_0 = arith.constant 0 : i32
    %c0_i32_1 = arith.constant 0 : i32
    return %c0_i32, %c0_i32_0 : i32, i32
  }
  func.func @transform_10(%arg0: i32) -> (i32, i32) {
    %c0_i32 = arith.constant 0 : i32
    %c0_i32_0 = arith.constant 0 : i32
    %c0_i32_1 = arith.constant 0 : i32
    return %c0_i32, %c0_i32_0 : i32, i32
  }
  func.func @transform_11(%arg0: i32) -> (i32, i32) {
    %c0_i32 = arith.constant 0 : i32
    %c0_i32_0 = arith.constant 0 : i32
    %c0_i32_1 = arith.constant 0 : i32
    return %c0_i32, %c0_i32_0 : i32, i32
  }
  func.func @transform_12(%arg0: i32) -> (i32, i32) {
    %c0_i32 = arith.constant 0 : i32
    %c0_i32_0 = arith.constant 0 : i32
    %c0_i32_1 = arith.constant 0 : i32
    return %c0_i32, %c0_i32_0 : i32, i32
  }
  func.func @transform_13(%arg0: i32) -> (i32, i32) {
    %c0_i32 = arith.constant 0 : i32
    %c0_i32_0 = arith.constant 0 : i32
    %c0_i32_1 = arith.constant 0 : i32
    return %c0_i32, %c0_i32_0 : i32, i32
  }
  func.func @transform_14(%arg0: i32) -> (i32, i32) {
    %c0_i32 = arith.constant 0 : i32
    %c0_i32_0 = arith.constant 0 : i32
    %c0_i32_1 = arith.constant 0 : i32
    return %c0_i32, %c0_i32_0 : i32, i32
  }
  func.func @transform_15(%arg0: i32) -> (i32, i32) {
    %c0_i32 = arith.constant 0 : i32
    %c0_i32_0 = arith.constant 0 : i32
    %c0_i32_1 = arith.constant 0 : i32
    return %c0_i32, %c0_i32_0 : i32, i32
  }
  func.func @transform_16(%arg0: i32) -> (i32, i32) {
    %c0_i32 = arith.constant 0 : i32
    %c0_i32_0 = arith.constant 0 : i32
    %c0_i32_1 = arith.constant 0 : i32
    return %c0_i32, %c0_i32_0 : i32, i32
  }
  func.func @transform_17(%arg0: i32) -> (i32, i32) {
    %c0_i32 = arith.constant 0 : i32
    %c0_i32_0 = arith.constant 0 : i32
    %c0_i32_1 = arith.constant 0 : i32
    return %c0_i32, %c0_i32_0 : i32, i32
  }
  func.func @transform_18(%arg0: i32) -> (i32, i32) {
    %c0_i32 = arith.constant 0 : i32
    %c0_i32_0 = arith.constant 0 : i32
    %c0_i32_1 = arith.constant 0 : i32
    return %c0_i32, %c0_i32_0 : i32, i32
  }
  func.func @transform_19(%arg0: i32) -> (i32, i32) {
    %c0_i32 = arith.constant 0 : i32
    %c0_i32_0 = arith.constant 0 : i32
    %c0_i32_1 = arith.constant 0 : i32
    return %c0_i32, %c0_i32_0 : i32, i32
  }
  func.func @transform_20(%arg0: i32) -> (i32, i32) {
    %c0_i32 = arith.constant 0 : i32
    %c0_i32_0 = arith.constant 0 : i32
    %c0_i32_1 = arith.constant 0 : i32
    return %c0_i32, %c0_i32_0 : i32, i32
  }
  func.func @transform_21(%arg0: i32) -> (i32, i32) {
    %c0_i32 = arith.constant 0 : i32
    %c0_i32_0 = arith.constant 0 : i32
    %c0_i32_1 = arith.constant 0 : i32
    return %c0_i32, %c0_i32_0 : i32, i32
  }
  func.func @transform_22(%arg0: i32) -> (i32, i32) {
    %c0_i32 = arith.constant 0 : i32
    %c0_i32_0 = arith.constant 0 : i32
    %c0_i32_1 = arith.constant 0 : i32
    return %c0_i32, %c0_i32_0 : i32, i32
  }
  func.func @transform_23(%arg0: i32) -> (i32, i32) {
    %c0_i32 = arith.constant 0 : i32
    %c0_i32_0 = arith.constant 0 : i32
    %c0_i32_1 = arith.constant 0 : i32
    return %c0_i32, %c0_i32_0 : i32, i32
  }
  func.func @transform_24(%arg0: i32) -> (i32, i32) {
    %c0_i32 = arith.constant 0 : i32
    %c0_i32_0 = arith.constant 0 : i32
    %c0_i32_1 = arith.constant 0 : i32
    return %c0_i32, %c0_i32_0 : i32, i32
  }
  func.func @transform_25(%arg0: i32) -> (i32, i32) {
    %c0_i32 = arith.constant 0 : i32
    %c0_i32_0 = arith.constant 0 : i32
    %c0_i32_1 = arith.constant 0 : i32
    return %c0_i32, %c0_i32_0 : i32, i32
  }
  func.func @transform_26(%arg0: i32) -> (i32, i32) {
    %c0_i32 = arith.constant 0 : i32
    %c0_i32_0 = arith.constant 0 : i32
    %c0_i32_1 = arith.constant 0 : i32
    return %c0_i32, %c0_i32_0 : i32, i32
  }
  func.func @transform_27(%arg0: i32) -> (i32, i32) {
    %c0_i32 = arith.constant 0 : i32
    %c0_i32_0 = arith.constant 0 : i32
    %c0_i32_1 = arith.constant 0 : i32
    return %c0_i32, %c0_i32_0 : i32, i32
  }
  func.func @transform_28(%arg0: i32) -> (i32, i32) {
    %c0_i32 = arith.constant 0 : i32
    %c0_i32_0 = arith.constant 0 : i32
    %c0_i32_1 = arith.constant 0 : i32
    return %c0_i32, %c0_i32_0 : i32, i32
  }
  func.func @transform_29(%arg0: i32) -> (i32, i32) {
    %c0_i32 = arith.constant 0 : i32
    %c0_i32_0 = arith.constant 0 : i32
    %c0_i32_1 = arith.constant 0 : i32
    return %c0_i32, %c0_i32_0 : i32, i32
  }
  func.func @transform_30(%arg0: i32) -> (i32, i32) {
    %c0_i32 = arith.constant 0 : i32
    %c0_i32_0 = arith.constant 0 : i32
    %c0_i32_1 = arith.constant 0 : i32
    return %c0_i32, %c0_i32_0 : i32, i32
  }
  func.func @transform_31(%arg0: i32) -> (i32, i32) {
    %c0_i32 = arith.constant 0 : i32
    %c0_i32_0 = arith.constant 0 : i32
    %c0_i32_1 = arith.constant 0 : i32
    return %c0_i32, %c0_i32_0 : i32, i32
  }
  func.func @transform_32(%arg0: i32) -> (i32, i32, i32) {
    %c0_i32 = arith.constant 0 : i32
    %c0_i32_0 = arith.constant 0 : i32
    %c0_i32_1 = arith.constant 0 : i32
    return %arg0, %c0_i32, %c0_i32_0 : i32, i32, i32
  }
}

</mosaic_0001>

<bundles_post_ra>
// kernel: tpu_custom_call.1
= control target key start
LH: loop header
LB: loop body
LE: loop exit
PB: predicated region body
PF: predicated region fallthrough
CT: control target
= control target key end

     0   :  { %s4489_s6 = smov 1   ;;  %s4490_s10 = smov 2   ;;  %s5186_s0 = inlined_call_operand.smem [shape: u32[33], index: -1, kind: input, shape index: {}] }
   0x1   :  { %s4549_s5 = sld [smem:[%s5186_s0]]   ;;  %s4491_s14 = smov 3  }
   0x2   :  { %s4554_s9 = sld [smem:[%s5186_s0 + %s4489_s6]]   ;;  %s4492_s18 = smov 4  }
   0x3   :  { %s4559_s13 = sld [smem:[%s5186_s0 + %s4490_s10]]   ;;  %s4493_s22 = smov 5  }
   0x4   :  { %s4564_s17 = sld [smem:[%s5186_s0 + %s4491_s14]]   ;;  %s4494_s26 = smov 6  }
   0x5   :  { %s4569_s21 = sld [smem:[%s5186_s0 + %s4492_s18]]   ;;  %s4495_s30 = smov 7  }
   0x6   :  { %s4574_s25 = sld [smem:[%s5186_s0 + %s4493_s22]]   ;;  %s4496_s4 = smov 8  }
   0x7   :  { %s4579_s29 = sld [smem:[%s5186_s0 + %s4494_s26]]   ;;  %s4497_s10 = smov 9  }
   0x8   :  { %5208 = sst [smem:[#allocation37_spill]] %s4554_s9  ;;  %s4498_s15 = smov 10  }
   0x9   :  { %5209 = sst [smem:[#allocation38_spill]] %s4559_s13  ;;  %s4499_s20 = smov 11  }
   0xa   :  { %5210 = sst [smem:[#allocation39_spill]] %s4564_s17  ;;  %s4500_s26 = smov 12  }
   0xb   :  { %5211 = sst [smem:[#allocation40_spill]] %s4569_s21  ;;  %s4501_s1 = smov 13  }
   0xc   :  { %s4584_s3 = sld [smem:[%s5186_s0 + %s4495_s30]]   ;;  %s4502_s7 = smov 14  }
   0xd   :  { %5212 = sst [smem:[#allocation41_spill]] %s4579_s29  ;;  %s4504_s22 = smov 16  }
   0xe   :  { %s4589_s8 = sld [smem:[%s5186_s0 + %s4496_s4]]   ;;  %s4505_s28 = smov 17  }
   0xf   :  { %s4594_s14 = sld [smem:[%s5186_s0 + %s4497_s10]]  }
  0x10   :  { %s4599_s19 = sld [smem:[%s5186_s0 + %s4498_s15]]   ;;  %s4503_s15 = smov 15  }
  0x11   :  { %s4604_s24 = sld [smem:[%s5186_s0 + %s4499_s20]]  }
  0x12   :  { %5213 = sst [smem:[#allocation42_spill]] %s4584_s3 }
  0x13   :  { %s4609_s30 = sld [smem:[%s5186_s0 + %s4500_s26]]  }
  0x14   :  { %s4614_s6 = sld [smem:[%s5186_s0 + %s4501_s1]]  }
  0x15   :  { %5214 = sst [smem:[#allocation43_spill]] %s4594_s14 }
  0x16   :  { %5215 = sst [smem:[#allocation44_spill]] %s4599_s19 }
  0x17   :  { %5216 = sst [smem:[#allocation45_spill]] %s4604_s24 }
  0x18   :  { %s4619_s12 = sld [smem:[%s5186_s0 + %s4502_s7]]   ;;  %s4506_s7 = smov 18  }
  0x19   :  { %s4624_s20 = sld [smem:[%s5186_s0 + %s4503_s15]]   ;;  %s4507_s15 = smov 19  }
  0x1a   :  { %5217 = sst [smem:[#allocation46_spill]] %s4614_s6 }
  0x1b   :  { %s4629_s27 = sld [smem:[%s5186_s0 + %s4504_s22]]   ;;  %s4508_s22 = smov 20  }
  0x1c   :  { %s4634_s4 = sld [smem:[%s5186_s0 + %s4505_s28]]   ;;  %s4509_s28 = smov 21  }
  0x1d   :  { %s4639_s17 = sld [smem:[%s5186_s0 + %s4506_s7]]   ;;  %s4510_s7 = smov 22  }
  0x1e   :  { %5218 = sst [smem:[#allocation47_spill]] %s4619_s12 }
  0x1f   :  { %5219 = sst [smem:[#allocation48_spill]] %s4624_s20 }
  0x20   :  { %s4644_s20 = sld [smem:[%s5186_s0 + %s4507_s15]]   ;;  %s4511_s15 = smov 23  }
  0x21   :  { %5220 = sst [smem:[#allocation49_spill]] %s4629_s27 }
  0x22   :  { %5221 = sst [smem:[#allocation50_spill]] %s4634_s4 }
  0x23   :  { %s4649_s12 = sld [smem:[%s5186_s0 + %s4508_s22]]   ;;  %s4512_s22 = smov 24  }
  0x24   :  { %s4654_s4 = sld [smem:[%s5186_s0 + %s4509_s28]]   ;;  %s4513_s28 = smov 25  }
  0x25   :  { %s4659_s6 = sld [smem:[%s5186_s0 + %s4510_s7]]   ;;  %s4514_s7 = smov 26  }
  0x26   :  { %5222 = sst [smem:[#allocation51_spill]] %s4644_s20 }
  0x27   :  { %s4664_s20 = sld [smem:[%s5186_s0 + %s4511_s15]]   ;;  %s4515_s15 = smov 27  }
  0x28   :  { %s4669_s24 = sld [smem:[%s5186_s0 + %s4512_s22]]   ;;  %s4516_s22 = smov 28  }
  0x29   :  { %5223 = sst [smem:[#allocation52_spill]] %s4649_s12 }
  0x2a   :  { %5224 = sst [smem:[#allocation53_spill]] %s4654_s4 }
  0x2b   :  { %5225 = sst [smem:[#allocation54_spill]] %s4659_s6 }
  0x2c   :  { %s4674_s4 = sld [smem:[%s5186_s0 + %s4513_s28]]   ;;  %s4517_s28 = smov 29  }
  0x2d   :  { %5226 = sst [smem:[#allocation55_spill]] %s4664_s20 }
  0x2e   :  { %5227 = sst [smem:[#allocation56_spill]] %s4669_s24 }
  0x2f   :  { %s4679_s14 = sld [smem:[%s5186_s0 + %s4514_s7]]   ;;  %s4518_s7 = smov 32  }
  0x30   :  { %s4684_s20 = sld [smem:[%s5186_s0 + %s4515_s15]]  }
  0x31   :  { %s4689_s24 = sld [smem:[%s5186_s0 + %s4516_s22]]  }
  0x32   :  { %5228 = sst [smem:[#allocation57_spill]] %s4674_s4 }
  0x33   :  { %s4694_s4 = sld [smem:[%s5186_s0 + %s4517_s28]]  }
  0x34   :  { %s4699_s3 = sld [smem:[%s5186_s0 + %s4518_s7]]  }
  0x35   :  { %5229 = sst [smem:[#allocation58_spill]] %s4679_s14 }
  0x36   :  { %5230 = sst [smem:[#allocation59_spill]] %s4684_s20 }
  0x39   :  { %5231 = sst [smem:[#allocation60_spill]] %s4694_s4 }
  0x3a   :  { %5232 = sst [smem:[#allocation61_spill]] %s4699_s3 }
  0x3b   :  { %70 = vsyncpa [#allocation4], 0 }
  0x3c   :  { %72 = vsyncpa [#allocation4 + $0x1], 0 }
  0x3d   :  { %73 = vsyncpa [#allocation7], 0 }
  0x3e   :  { %75 = vsyncpa [#allocation7 + $0x1], 0 }
  0x3f   :  { %76 = vsyncpa [#allocation10], 0 }
  0x40   :  { %77 = vsyncpa [#allocation13], 0 }
  0x41   :  { %78 = vsyncpa [#allocation16], 0 }
  0x42   :  { %79 = vsyncpa [#allocation19], 0 }
  0x43   :  { %80 = vsyncpa [#allocation22], 0 }
  0x44   :  { %81 = vsyncpa [#allocation25], 0 }
  0x45   :  { %82 = vsyncpa [#allocation5], 0 }
  0x46   :  { %84 = vsyncpa [#allocation5 + $0x1], 0  ;;  %s4701_s15 = smov 0   ;;  %s4703_s16 = smov 0  }
  0x47   :  { %s4705_s18 = smov 0   ;;  %s4707_s0 = smov 0  }
  0x48 LB: > { %s5233_s6 = sld [smem:[#allocation54_spill]]  ;;  %s4725_s23 = sadd.s32 4294967295, %s4487_s0   ;;  %s4487_s0 = sphi %s4707_s0, %s5294_s0   ;;  %s4483_s18 = sphi %s4705_s18, %s5291_s18   ;;  %s4479_s16 = sphi %s4703_s16, %s5293_s16   ;;  %s4475_s15 = sphi %s4701_s15, %s5292_s15  }
  0x49   : > { %s5234_s9 = sld [smem:[#allocation37_spill]]  ;;  %p3137_p0 = scmp.ge.s32.totalorder %s4487_s0, 1 }
  0x4a   : > { %s5235_s27 = sld [smem:[#allocation49_spill]]  ;;  %p5203_p1 = scmp.eq.s32.totalorder %s4725_s23, 0 }
  0x4b   : > { %s5236_s19 = sld [smem:[#allocation44_spill]]  ;;  %p813_p2 = scmp.lt.s32.totalorder %s4487_s0, 3 }
  0x4c   : > { %s5237_s14 = sld [smem:[#allocation58_spill]]  ;;  %s4519_s28 = smov [#allocation9]  }
  0x4d   : > { %s5238_s12 = sld [smem:[#allocation52_spill]]  ;;  %p4730_p3 = pnand %p3137_p0, %p813_p2 }
  0x4e   : > { %s5239_s29 = sld [smem:[#allocation41_spill]]  ;;  %s827_s1 = sshll.u32 %s4519_s28, 4  ;;  %s828_s1 = int_to_ptr.vmem [resolvable:$true] %s827_s1 }
  0x4f   : > { %s5240_s21 = sld [smem:[#allocation40_spill]]  ;;  %p3727_p5 = pneg %p4730_p3 }
  0x50   : > { %5241 = sst [smem:[#allocation62_spill]] %s4483_s18  ;;  %s4520_s10 = smov [#allocation12]  }
  0x51   : > { %s5242_s26 = scalar_select %p4730_p3, 1, 0 }
  0x52   : > { %p4742_p6 = pnand %p3727_p5, %p5203_p1  ;;  %s4746_s11 = sshll.u32 %s4520_s10, 4 }
  0x53   : > { %5243 = sst [smem:[#allocation63_spill]] %s5242_s26 }
  0x54   : > { %s848_s2 = sshll.u32 %s5239_s29, 4  ;;  %5245 = sst [smem:[#allocation64_spill]] %s4746_s11  ;;  %s4738_s2 = int_to_ptr.hbm [resolvable:$true] %s848_s2 }
  0x55   : > { %s825_s22 = sshll.u32 %s5240_s21, 4  ;;  %p4752_p8 = pneg %p4742_p6  ;;  %s4722_s22 = int_to_ptr.hbm [resolvable:$true] %s825_s22 }
  0x56   : > { %s3943_s28 = sshra.s32 %s4722_s22, 4  ;;  %s3950_s20 = scalar_lea.hbm %s5240_s21, 1  ;;  %s3944_s28 = int_to_ptr.hbm [resolvable:$true] %s3943_s28 }
  0x57   : > { %s3945_s3 = scalar_lea.hbm %s3944_s28, 1  ;;  %p3951_p11 = scmp.lt.s32.totalorder %s3944_s28, %s5240_s21 }
  0x58   : > { %p3946_p7 = scmp.ne.s32.totalorder %s3944_s28, %s3945_s3  ;;  %p3952_p12 = scmp.lt.s32.totalorder %s3950_s20, %s3945_s3 }
  0x5a   : > { %p3948_p9 = pnand %p4752_p8, %p3946_p7  ;;  %p3953_p13 = por %p3952_p12, %p3951_p11 }
  0x5c   : > { %p3949_p10 = pneg %p3948_p9 }
  0x5e   : > { %p3954_p0 = pnand %p3953_p13, %p3949_p10 }
  0x60   : > { %3957 = shalt.err (!%p3954_p0)
}
  0x61   : > { %3730 = dma.hbm_to_vmem [thread:$0]  (!%p4742_p6), %s4722_s22, 16, %s828_s1, [#allocation10]  }
  0x62   : > { %s3973_s10 = sshra.s32 %s4738_s2, 4  ;;  %s3980_s28 = scalar_lea.hbm %s5239_s29, 64  ;;  %s3974_s10 = int_to_ptr.hbm [resolvable:$true] %s3973_s10 }
  0x63   : > { %s3975_s11 = scalar_lea.hbm %s3974_s10, 64  ;;  %p3981_p9 = scmp.lt.s32.totalorder %s3974_s10, %s5239_s29 }
  0x64   : > { %p3976_p2 = scmp.ne.s32.totalorder %s3974_s10, %s3975_s11  ;;  %p3982_p11 = scmp.lt.s32.totalorder %s3980_s28, %s3975_s11 }
  0x66   : > { %p3978_p5 = pnand %p3976_p2, %p4752_p8  ;;  %p3983_p10 = por %p3982_p11, %p3981_p9 }
  0x68   : > { %p3979_p7 = pneg %p3978_p5 }
  0x6a   : > { %p3984_p12 = pnand %p3983_p10, %p3979_p7 }
  0x6c   : > { %3987 = shalt.err (!%p3984_p12)
}
  0x6d   : > { %s5194_s3 = smov 64   ;;  %s5247_s20 = sld [smem:[#allocation64_spill]] }
  0x6e   : > { %s5196_s22 = smov 4   ;;  %s882_s11 = sshll.u32 %s5236_s19, 4  ;;  %s883_s11 = int_to_ptr.hbm [resolvable:$true] %s882_s11 }
  0x6f   : > { %s4523_s10 = smov [#allocation15]   ;;  %s922_s21 = sshll.u32 %s5235_s27, 4  ;;  %s923_s21 = int_to_ptr.hbm [resolvable:$true] %s922_s21 }
  0x70   : > { %s884_s28 = sshll.u32 %s4523_s10, 4  ;;  %s4003_s29 = sshra.s32 %s883_s11, 4  ;;  %s885_s28 = int_to_ptr.vmem [resolvable:$true] %s884_s28  ;;  %s4004_s29 = int_to_ptr.hbm [resolvable:$true] %s4003_s29 }
  0x71   : > { %s4005_s26 = scalar_lea.hbm %s4004_s29, 64  ;;  %s4010_s13 = scalar_lea.hbm %s5236_s19, 64 }
  0x72   : > { %p4006_p13 = scmp.ne.s32.totalorder %s4004_s29, %s4005_s26  ;;  %p4011_p5 = scmp.lt.s32.totalorder %s4004_s29, %s5236_s19 }
  0x73   : > { %s5248_s1 = int_to_ptr.vmem [resolvable:$true] %s5247_s20  ;;  %p4012_p7 = scmp.lt.s32.totalorder %s4010_s13, %s4005_s26 }
  0x74   : > { %3736 = dma.hbm_to_vmem [thread:$0]  (!%p4742_p6), %s4738_s2, 1024, %s5248_s1, [#allocation13], %s5194_s3, %s5194_s3, %s5196_s22  }
  0x75   : > { %p4008_p0 = pnand %p4006_p13, %p4752_p8  ;;  %p4013_p9 = por %p4012_p7, %p4011_p5 }
  0x77   : > { %p4009_p2 = pneg %p4008_p0 }
  0x79   : > { %p4014_p11 = pnand %p4013_p9, %p4009_p2 }
  0x7b   : > { %4017 = shalt.err (!%p4014_p11)
}
  0x7c   : > { %3742 = dma.hbm_to_vmem [thread:$0]  (!%p4742_p6), %s883_s11, 1024, %s885_s28, [#allocation16], %s5194_s3, %s5194_s3, %s5196_s22  }
  0x7d   : > { %s4524_s2 = smov [#allocation18]   ;;  %s956_s1 = sshll.u32 %s5238_s12, 4  ;;  %s4788_s1 = int_to_ptr.hbm [resolvable:$true] %s956_s1 }
  0x7e   : > { %s924_s20 = sshll.u32 %s4524_s2, 4  ;;  %s4033_s13 = sshra.s32 %s923_s21, 4  ;;  %s925_s20 = int_to_ptr.vmem [resolvable:$true] %s924_s20  ;;  %s4034_s13 = int_to_ptr.hbm [resolvable:$true] %s4033_s13 }
  0x7f   : > { %s4035_s29 = scalar_lea.hbm %s4034_s13, 64  ;;  %s4040_s26 = scalar_lea.hbm %s5235_s27, 64 }
  0x80   : > { %p4036_p10 = scmp.ne.s32.totalorder %s4034_s13, %s4035_s29  ;;  %p4041_p0 = scmp.lt.s32.totalorder %s4034_s13, %s5235_s27 }
  0x81   : > { %p4042_p2 = scmp.lt.s32.totalorder %s4040_s26, %s4035_s29 }
  0x82   : > { %p4038_p12 = pnand %p4036_p10, %p4752_p8 }
  0x83   : > { %p4043_p5 = por %p4042_p2, %p4041_p0 }
  0x84   : > { %p4039_p13 = pneg %p4038_p12 }
  0x86   : > { %p4044_p7 = pnand %p4043_p5, %p4039_p13 }
  0x88   : > { %4047 = shalt.err (!%p4044_p7)
}
  0x89   : > { %3748 = dma.hbm_to_vmem [thread:$0]  (!%p4742_p6), %s923_s21, 1024, %s925_s20, [#allocation19], %s5194_s3, %s5194_s3, %s5196_s22  }
  0x8a   : > { %s996_s11 = sshll.u32 %s5237_s14, 4  ;;  %s4525_s10 = smov [#allocation21]   ;;  %s4800_s11 = int_to_ptr.hbm [resolvable:$true] %s996_s11 }
  0x8b   : > { %s958_s28 = sshll.u32 %s4525_s10, 4  ;;  %s4063_s2 = sshra.s32 %s4788_s1, 4  ;;  %s959_s28 = int_to_ptr.vmem [resolvable:$true] %s958_s28  ;;  %s4064_s2 = int_to_ptr.hbm [resolvable:$true] %s4063_s2 }
  0x8c   : > { %s4065_s13 = scalar_lea.hbm %s4064_s2, 64  ;;  %s4070_s29 = scalar_lea.hbm %s5238_s12, 64 }
  0x8d   : > { %p4066_p9 = scmp.ne.s32.totalorder %s4064_s2, %s4065_s13  ;;  %p4071_p12 = scmp.lt.s32.totalorder %s4064_s2, %s5238_s12 }
  0x8e   : > { %p4072_p13 = scmp.lt.s32.totalorder %s4070_s29, %s4065_s13 }
  0x8f   : > { %p4068_p11 = pnand %p4066_p9, %p4752_p8 }
  0x90   : > { %p4073_p0 = por %p4072_p13, %p4071_p12 }
  0x91   : > { %p4069_p10 = pneg %p4068_p11 }
  0x93   : > { %p4074_p2 = pnand %p4073_p0, %p4069_p10 }
  0x95   : > { %4077 = shalt.err (!%p4074_p2)
}
  0x96   : > { %3754 = dma.hbm_to_vmem [thread:$0]  (!%p4742_p6), %s4788_s1, 1024, %s959_s28, [#allocation22], %s5194_s3, %s5194_s3, %s5196_s22  }
  0x97   : > { %s4526_s21 = smov [#allocation24]   ;;  %s4093_s26 = sshra.s32 %s4800_s11, 4  ;;  %s4094_s26 = int_to_ptr.hbm [resolvable:$true] %s4093_s26 }
  0x98   : > { %s998_s20 = sshll.u32 %s4526_s21, 4  ;;  %s4095_s10 = scalar_lea.hbm %s4094_s26, 128  ;;  %s999_s20 = int_to_ptr.vmem [resolvable:$true] %s998_s20 }
  0x99   : > { %p4096_p5 = scmp.ne.s32.totalorder %s4094_s26, %s4095_s10  ;;  %s4100_s2 = scalar_lea.hbm %s5237_s14, 128 }
  0x9a   : > { %p4101_p11 = scmp.lt.s32.totalorder %s4094_s26, %s5237_s14  ;;  %p4102_p10 = scmp.lt.s32.totalorder %s4100_s2, %s4095_s10 }
  0x9b   : > { %p4098_p7 = pnand %p4096_p5, %p4752_p8 }
  0x9c   : > { %p4103_p12 = por %p4102_p10, %p4101_p11 }
  0x9d   : > { %p4099_p9 = pneg %p4098_p7 }
  0x9f   : > { %p4104_p13 = pnand %p4103_p12, %p4099_p9 }
  0xa1   : > { %4107 = shalt.err (!%p4104_p13)
}
  0xa2   : > { %s4527_s13 = smov 128   ;;  %s4528_s1 = smov 8  }
  0xa3   : > { %3760 = dma.hbm_to_vmem [thread:$0]  (!%p4742_p6), %s4800_s11, 2048, %s999_s20, [#allocation25], %s4527_s13, %s4527_s13, %s4528_s1  }
  0xa4   : > { %s3136_s28 = sadd.s32 4294967294, %s4487_s0   ;;  %s4823_s29 = sadd.s32 1, %s4487_s0  }
  0xa5   : > { %s94_s21 = ssub.s32 %s4487_s0, %s4823_s29  ;;  %s97_s26 = sadd.s32 1, %s4483_s18 }
  0xa6   : > { %p95_p0 = scmp.eq.s32.totalorder %s94_s21, 0  ;;  %p104_p2 = scmp.ne.s32.totalorder %s4483_s18, %s4479_s16 }
  0xa7   : > { %p105_p5 = scmp.eq.s32.totalorder %s4487_s0, 0  ;;  %p110_p7 = scmp.ne.s32.totalorder %s4479_s16, %s4475_s15 }
  0xa8   : > { %s4834_s10 = scalar_select %p95_p0, %s4483_s18, %s97_s26  }
  0xa9   : > { %p106_p9 = por %p105_p5, %p104_p2  ;;  %p4838_p11 = por %p5203_p1, %p110_p7 }
  0xaa   : > { %5249 = sst [smem:[#allocation65_spill]] %s4834_s10  ;;  %p800_p10 = scmp.eq.s32.totalorder %s4725_s23, 1 }
  0xab   : > { %p806_p12 = scmp.eq.s32.totalorder %s3136_s28, 1  ;;  %p3790_p13 = scmp.lt.s32.totalorder %s4487_s0, 2 }
  0xac   : > { %s4845_s20 = sand.u32 1, %s4483_s18   ;;  %p4847_p4 = por %p800_p10, %p104_p2 }
  0xad   : > { %p4851_p3 = por %p806_p12, %p110_p7  ;;  %s5204_s1 = sshll.u32 %s4845_s20, 3 }
  0xae   : > { %s5205_s21 = sshll.u32 %s4487_s0, 3  ;;  %p4857_p0 = pnand %p3790_p13, %p106_p9 }
  0xaf   : > { %s1057_s28 = sand.u32 1, %s4487_s0   ;;  %s1065_s3 = scalar_lea.hbm %s5234_s9, %s5205_s21 }
  0xb0   : > { %s1067_s22 = sshll.u32 %s1065_s3, 4  ;;  %s1061_s12 = scalar_lea.vmem [#allocation6], %s5204_s1  ;;  %s1068_s22 = int_to_ptr.hbm [resolvable:$true] %s1067_s22 }
  0xb1   : > { %s1069_s14 = sshll.u32 %s1061_s12, 4  ;;  %s4867_s19 = scalar_lea.sflag [#allocation7], %s1057_s28  ;;  %s1070_s14 = int_to_ptr.vmem [resolvable:$true] %s1069_s14 }
  0xb2   : > { %s4123_s27 = sshra.s32 %s1068_s22, 4  ;;  %p4127_p5 = pneg %p4857_p0  ;;  %s4124_s27 = int_to_ptr.hbm [resolvable:$true] %s4123_s27 }
  0xb3   : > { %s4125_s10 = scalar_lea.hbm %s4124_s27, 8  ;;  %s4130_s18 = scalar_lea.hbm %s5234_s9, 16 }
  0xb4   : > { %p4126_p2 = scmp.ne.s32.totalorder %s4124_s27, %s4125_s10  ;;  %p4131_p10 = scmp.lt.s32.totalorder %s4124_s27, %s5234_s9 }
  0xb5   : > { %p4132_p12 = scmp.lt.s32.totalorder %s4130_s18, %s4125_s10 }
  0xb6   : > { %p4128_p7 = pnand %p4127_p5, %p4126_p2 }
  0xb7   : > { %p4133_p13 = por %p4132_p12, %p4131_p10 }
  0xb8   : > { %p4129_p9 = pneg %p4128_p7 }
  0xba   : > { %p4134_p1 = pnand %p4133_p13, %p4129_p9 }
  0xbc   : > { %4137 = shalt.err (!%p4134_p1)
}
  0xbd   : > { %3770 = dma.hbm_to_vmem [thread:$0]  (!%p4857_p0), %s1068_s22, 128, %s1070_s14, %s4867_s19  }
  0xbe   : > { %s837_s12 = sshll.u32 %s4574_s25, 4  ;;  %s4529_s3 = smov [#allocation11]   ;;  %s838_s12 = int_to_ptr.hbm [resolvable:$true] %s837_s12 }
  0xbf   : > { %s839_s28 = sshll.u32 %s4529_s3, 4  ;;  %s865_s1 = sshll.u32 %s4589_s8, 4  ;;  %s840_s28 = int_to_ptr.vmem [resolvable:$true] %s839_s28  ;;  %s866_s1 = int_to_ptr.hbm [resolvable:$true] %s865_s1 }
  0xc0   : > { %s4153_s27 = sshra.s32 %s838_s12, 4  ;;  %s4160_s10 = scalar_lea.hbm %s4574_s25, 1  ;;  %s4154_s27 = int_to_ptr.hbm [resolvable:$true] %s4153_s27 }
  0xc1   : > { %s4155_s18 = scalar_lea.hbm %s4154_s27, 1  ;;  %p4161_p9 = scmp.lt.s32.totalorder %s4154_s27, %s4574_s25 }
  0xc2   : > { %p4156_p2 = scmp.ne.s32.totalorder %s4154_s27, %s4155_s18  ;;  %p4162_p10 = scmp.lt.s32.totalorder %s4160_s10, %s4155_s18 }
  0xc4   : > { %p4158_p1 = pnand %p4156_p2, %p4752_p8  ;;  %p4163_p12 = por %p4162_p10, %p4161_p9 }
  0xc6   : > { %p4159_p7 = pneg %p4158_p1 }
  0xc8   : > { %p4164_p13 = pnand %p4163_p12, %p4159_p7 }
  0xca   : > { %4167 = shalt.err (!%p4164_p13)
}
  0xcb   : > { %3733 = dma.hbm_to_vmem [thread:$0]  (!%p4742_p6), %s838_s12, 16, %s840_s28, [#allocation10]  }
  0xcc   : > { %s4530_s14 = smov [#allocation14]   ;;  %s899_s3 = sshll.u32 %s4609_s30, 4  ;;  %s4888_s3 = int_to_ptr.hbm [resolvable:$true] %s899_s3 }
  0xcd   : > { %s867_s22 = sshll.u32 %s4530_s14, 4  ;;  %s4183_s21 = sshra.s32 %s866_s1, 4  ;;  %s868_s22 = int_to_ptr.vmem [resolvable:$true] %s867_s22  ;;  %s4184_s21 = int_to_ptr.hbm [resolvable:$true] %s4183_s21 }
  0xce   : > { %s4185_s27 = scalar_lea.hbm %s4184_s21, 64  ;;  %s4190_s18 = scalar_lea.hbm %s4589_s8, 64 }
  0xcf   : > { %p4186_p2 = scmp.ne.s32.totalorder %s4184_s21, %s4185_s27  ;;  %p4191_p9 = scmp.lt.s32.totalorder %s4184_s21, %s4589_s8 }
  0xd0   : > { %p4192_p10 = scmp.lt.s32.totalorder %s4190_s18, %s4185_s27 }
  0xd1   : > { %p4188_p1 = pnand %p4186_p2, %p4752_p8 }
  0xd2   : > { %p4193_p12 = por %p4192_p10, %p4191_p9 }
  0xd3   : > { %p4189_p7 = pneg %p4188_p1 }
  0xd5   : > { %p4194_p13 = pnand %p4193_p12, %p4189_p7 }
  0xd7   : > { %4197 = shalt.err (!%p4194_p13)
}
  0xd8   : > { %s5254_s12 = smov 4   ;;  %s5255_s28 = smov 64  }
  0xd9   : > { %3739 = dma.hbm_to_vmem [thread:$0]  (!%p4742_p6), %s866_s1, 1024, %s868_s22, [#allocation13], %s5255_s28, %s5255_s28, %s5254_s12  }
  0xda   : > { %s939_s10 = sshll.u32 %s4639_s17, 4  ;;  %s4531_s14 = smov [#allocation17]   ;;  %s4900_s10 = int_to_ptr.hbm [resolvable:$true] %s939_s10 }
  0xdb   : > { %s901_s9 = sshll.u32 %s4531_s14, 4  ;;  %s4213_s21 = sshra.s32 %s4888_s3, 4  ;;  %s902_s9 = int_to_ptr.vmem [resolvable:$true] %s901_s9  ;;  %s4214_s21 = int_to_ptr.hbm [resolvable:$true] %s4213_s21 }
  0xdc   : > { %s4215_s27 = scalar_lea.hbm %s4214_s21, 64  ;;  %s4220_s18 = scalar_lea.hbm %s4609_s30, 64 }
  0xdd   : > { %p4216_p2 = scmp.ne.s32.totalorder %s4214_s21, %s4215_s27  ;;  %p4221_p9 = scmp.lt.s32.totalorder %s4214_s21, %s4609_s30 }
  0xde   : > { %p4222_p10 = scmp.lt.s32.totalorder %s4220_s18, %s4215_s27 }
  0xdf   : > { %p4218_p1 = pnand %p4216_p2, %p4752_p8 }
  0xe0   : > { %p4223_p12 = por %p4222_p10, %p4221_p9 }
  0xe1   : > { %p4219_p7 = pneg %p4218_p1 }
  0xe3   : > { %p4224_p13 = pnand %p4223_p12, %p4219_p7 }
  0xe5   : > { %4227 = shalt.err (!%p4224_p13)
}
  0xe6   : > { %3745 = dma.hbm_to_vmem [thread:$0]  (!%p4742_p6), %s4888_s3, 1024, %s902_s9, [#allocation16], %s5255_s28, %s5255_s28, %s5254_s12  }
  0xe7   : > { %s4532_s1 = smov [#allocation20]   ;;  %s973_s14 = sshll.u32 %s5233_s6, 4  ;;  %s4914_s14 = int_to_ptr.hbm [resolvable:$true] %s973_s14 }
  0xe8   : > { %s941_s22 = sshll.u32 %s4532_s1, 4  ;;  %s4243_s21 = sshra.s32 %s4900_s10, 4  ;;  %s942_s22 = int_to_ptr.vmem [resolvable:$true] %s941_s22  ;;  %s4244_s21 = int_to_ptr.hbm [resolvable:$true] %s4243_s21 }
  0xe9   : > { %s4245_s27 = scalar_lea.hbm %s4244_s21, 64  ;;  %s4250_s18 = scalar_lea.hbm %s4639_s17, 64 }
  0xea   : > { %p4246_p2 = scmp.ne.s32.totalorder %s4244_s21, %s4245_s27  ;;  %p4251_p9 = scmp.lt.s32.totalorder %s4244_s21, %s4639_s17 }
  0xeb   : > { %p4252_p10 = scmp.lt.s32.totalorder %s4250_s18, %s4245_s27 }
  0xec   : > { %p4248_p1 = pnand %p4246_p2, %p4752_p8 }
  0xed   : > { %p4253_p12 = por %p4252_p10, %p4251_p9 }
  0xee   : > { %p4249_p7 = pneg %p4248_p1 }
  0xf0   : > { %p4254_p13 = pnand %p4253_p12, %p4249_p7 }
  0xf2   : > { %4257 = shalt.err (!%p4254_p13)
}
  0xf3   : > { %3751 = dma.hbm_to_vmem [thread:$0]  (!%p4742_p6), %s4900_s10, 1024, %s942_s22, [#allocation19], %s5255_s28, %s5255_s28, %s5254_s12  }
  0xf4   : > { %s1013_s9 = sshll.u32 %s4689_s24, 4  ;;  %s4533_s3 = smov [#allocation23]   ;;  %s4928_s9 = int_to_ptr.hbm [resolvable:$true] %s1013_s9 }
  0xf5   : > { %s975_s1 = sshll.u32 %s4533_s3, 4  ;;  %s4273_s21 = sshra.s32 %s4914_s14, 4  ;;  %s976_s1 = int_to_ptr.vmem [resolvable:$true] %s975_s1  ;;  %s4274_s21 = int_to_ptr.hbm [resolvable:$true] %s4273_s21 }
  0xf6   : > { %s4275_s27 = scalar_lea.hbm %s4274_s21, 64  ;;  %s4280_s18 = scalar_lea.hbm %s5233_s6, 64 }
  0xf7   : > { %p4276_p2 = scmp.ne.s32.totalorder %s4274_s21, %s4275_s27  ;;  %p4281_p9 = scmp.lt.s32.totalorder %s4274_s21, %s5233_s6 }
  0xf8   : > { %p4282_p10 = scmp.lt.s32.totalorder %s4280_s18, %s4275_s27 }
  0xf9   : > { %p4278_p1 = pnand %p4276_p2, %p4752_p8 }
  0xfa   : > { %p4283_p12 = por %p4282_p10, %p4281_p9 }
  0xfb   : > { %p4279_p7 = pneg %p4278_p1 }
  0xfd   : > { %p4284_p13 = pnand %p4283_p12, %p4279_p7 }
  0xff   : > { %4287 = shalt.err (!%p4284_p13)
}
 0x100   : > { %3757 = dma.hbm_to_vmem [thread:$0]  (!%p4742_p6), %s4914_s14, 1024, %s976_s1, [#allocation22], %s5255_s28, %s5255_s28, %s5254_s12  }
 0x101   : > { %s4534_s10 = smov [#allocation26]   ;;  %s4303_s3 = sshra.s32 %s4928_s9, 4  ;;  %s4304_s3 = int_to_ptr.hbm [resolvable:$true] %s4303_s3 }
 0x102   : > { %s1015_s22 = sshll.u32 %s4534_s10, 4  ;;  %s4305_s21 = scalar_lea.hbm %s4304_s3, 128  ;;  %s1016_s22 = int_to_ptr.vmem [resolvable:$true] %s1015_s22 }
 0x103   : > { %p4306_p2 = scmp.ne.s32.totalorder %s4304_s3, %s4305_s21  ;;  %s4310_s27 = scalar_lea.hbm %s4689_s24, 128 }
 0x104   : > { %p4311_p9 = scmp.lt.s32.totalorder %s4304_s3, %s4689_s24  ;;  %p4312_p10 = scmp.lt.s32.totalorder %s4310_s27, %s4305_s21 }
 0x105   : > { %p4308_p1 = pnand %p4306_p2, %p4752_p8 }
 0x106   : > { %p4313_p12 = por %p4312_p10, %p4311_p9 }
 0x107   : > { %p4309_p7 = pneg %p4308_p1 }
 0x109   : > { %p4314_p13 = pnand %p4313_p12, %p4309_p7 }
 0x10b   : > { %4317 = shalt.err (!%p4314_p13)
}
 0x10c   : > { %3763 = dma.hbm_to_vmem [thread:$0]  (!%p4742_p6), %s4928_s9, 2048, %s1016_s22, [#allocation25], %s5255_s28, %s5255_s28, %s5254_s12  }
 0x10d   : > { %s5256_s4 = sshll.u32 %s4487_s0, 3  ;;  %s5257_s1 = sshll.u32 %s4845_s20, 3 }
 0x10e   : > { %s1046_s14 = scalar_lea.hbm %s4549_s5, %s5256_s4  ;;  %s1042_s18 = scalar_lea.vmem [#allocation3], %s5257_s1 }
 0x10f   : > { %s1050_s10 = sshll.u32 %s1042_s18, 4  ;;  %s1048_s3 = sshll.u32 %s1046_s14, 4  ;;  %s1051_s10 = int_to_ptr.vmem [resolvable:$true] %s1050_s10  ;;  %s1049_s3 = int_to_ptr.hbm [resolvable:$true] %s1048_s3 }
 0x110   : > { %s1039_s7 = scalar_lea.sflag [#allocation4], %s4845_s20  ;;  %s4333_s21 = sshra.s32 %s1049_s3, 4  ;;  %s4334_s21 = int_to_ptr.hbm [resolvable:$true] %s4333_s21 }
 0x111   : > { %s4335_s27 = scalar_lea.hbm %s4334_s21, 8  ;;  %s4340_s6 = scalar_lea.hbm %s4549_s5, 16 }
 0x112   : > { %p4336_p8 = scmp.ne.s32.totalorder %s4334_s21, %s4335_s27  ;;  %p4341_p7 = scmp.lt.s32.totalorder %s4334_s21, %s4549_s5 }
 0x113   : > { %p4342_p6 = scmp.lt.s32.totalorder %s4340_s6, %s4335_s27 }
 0x114   : > { %p4338_p2 = pnand %p4336_p8, %p4127_p5 }
 0x115   : > { %p4343_p9 = por %p4342_p6, %p4341_p7 }
 0x116   : > { %p4339_p1 = pneg %p4338_p2 }
 0x118   : > { %p4344_p10 = pnand %p4343_p9, %p4339_p1 }
 0x11a   : > { %4347 = shalt.err (!%p4344_p10)
}
 0x11b   : > { %s5258_s12 = sld [smem:[#allocation38_spill]]  ;;  %s1079_s9 = scalar_lea.vmem [#allocation8], %s4845_s20 }
 0x11c   : > { %3767 = dma.hbm_to_vmem [thread:$0]  (!%p4857_p0), %s1049_s3, 128, %s1051_s10, %s1039_s7  }
 0x11d   : > { %s1086_s22 = sshll.u32 %s1079_s9, 4  ;;  %s1087_s22 = int_to_ptr.vmem [resolvable:$true] %s1086_s22 }
 0x121   : > { %s1082_s28 = scalar_lea.hbm %s5258_s12, %s4487_s0  ;;  %s4370_s1 = scalar_lea.hbm %s5258_s12, 2 }
 0x122   : > { %s1084_s4 = sshll.u32 %s1082_s28, 4  ;;  %s1085_s4 = int_to_ptr.hbm [resolvable:$true] %s1084_s4 }
 0x123   : > { %s4363_s14 = sshra.s32 %s1085_s4, 4  ;;  %s4364_s14 = int_to_ptr.hbm [resolvable:$true] %s4363_s14 }
 0x124   : > { %s4365_s6 = scalar_lea.hbm %s4364_s14, 1  ;;  %p4371_p2 = scmp.lt.s32.totalorder %s4364_s14, %s5258_s12 }
 0x125   : > { %p4366_p12 = scmp.ne.s32.totalorder %s4364_s14, %s4365_s6  ;;  %p4372_p1 = scmp.lt.s32.totalorder %s4370_s1, %s4365_s6 }
 0x127   : > { %p4368_p13 = pnand %p4366_p12, %p4127_p5  ;;  %p4373_p7 = por %p4372_p1, %p4371_p2 }
 0x129   : > { %p4369_p8 = pneg %p4368_p13 }
 0x12b   : > { %p4374_p6 = pnand %p4373_p7, %p4369_p8 }
 0x12d   : > { %4377 = shalt.err (!%p4374_p6)
}
 0x12e   : > { %3773 = dma.hbm_to_vmem [thread:$0]  (!%p4857_p0), %s1085_s4, 16, %s1087_s22, %s4867_s19  }
 0x12f   : > { %s5259_s20 = sld [smem:[#allocation63_spill]] }
 0x135   : > { %p5260_p9 = scmp.ne.s32.totalorder %s5259_s20, 0 }
 0x136   : > { %s4979_s18 = sand.u32 (!%p5260_p9), 1, %s4479_s16  }
 0x137   : > { %1101 = sbr.rel (%p5260_p9) target bundleno = 3770 (0xeba), region = 148  ;;  %s4982_s10 = sshll.u32 (!%p5260_p9), %s4979_s18, 3 }
 0x138   : > { %s1104_s3 = scalar_lea.sflag (!%p5260_p9), [#allocation4], %s4979_s18  ;;  %s1107_s7 = scalar_lea.vmem (!%p5260_p9), [#allocation3], %s4982_s10 }
 0x13c   : > { %4438 = dma.done.wait (%p4838_p11), %s1104_s3, 128  }
 0x13d   : > { %4440 = vsyncadd (%p4838_p11), %s1104_s3, 4294967168  ;;  %s1113_s19 = sand.u32 1, %s4725_s23   ;;  %s1117_s21 = scalar_lea.vmem [#allocation6], %s4982_s10 }
 0x13e   : > { %s1114_s26 = scalar_lea.sflag [#allocation7], %s1113_s19 }
 0x13f   : > { %4442 = dma.done.wait (%p4838_p11), %s1114_s26, 144  }
 0x140   : > { %4444 = vsyncadd (%p4838_p11), %s1114_s26, 4294967152  ;;  %s1126_s27 = scalar_lea.vmem [#allocation8], %s4979_s18  ;;  %p5261_p0 = scmp.eq.s32.totalorder %s4725_s23, 0 }
 0x142   : > { %4446 = dma.done.wait (%p5261_p0), [#allocation10], 32   ;;  %p5262_p5 = pmov %p5261_p0 }
 0x143   : > { %p5263_p10 = pmov %p5261_p0 }
 0x144   : > { %4448 = vsyncadd (%p5262_p5), [#allocation10], 4294967264 }
 0x145   : > { %4450 = dma.done.wait (%p5263_p10), [#allocation13], 2048   ;;  %p5264_p12 = pmov %p5261_p0 }
 0x146   : > { %p5265_p13 = pmov %p5261_p0 }
 0x147   : > { %4452 = vsyncadd (%p5264_p12), [#allocation13], 4294965248 }
 0x148   : > { %4454 = dma.done.wait (%p5265_p13), [#allocation16], 2048   ;;  %p5266_p8 = pmov %p5261_p0 }
 0x149   : > { %p5267_p11 = pmov %p5261_p0 }
 0x14a   : > { %4456 = vsyncadd (%p5266_p8), [#allocation16], 4294965248 }
 0x14b   : > { %4458 = dma.done.wait (%p5267_p11), [#allocation19], 2048   ;;  %p5268_p2 = pmov %p5261_p0 }
 0x14c   : > { %p5269_p1 = pmov %p5261_p0 }
 0x14d   : > { %4460 = vsyncadd (%p5268_p2), [#allocation19], 4294965248 }
 0x14e   : > { %4462 = dma.done.wait (%p5269_p1), [#allocation22], 2048   ;;  %p5270_p7 = pmov %p5261_p0 }
 0x14f   : > { %p5271_p6 = pmov %p5261_p0 }
 0x150   : > { %4464 = vsyncadd (%p5270_p7), [#allocation22], 4294965248 }
 0x151   : > { %4466 = dma.done.wait (%p5271_p6), [#allocation25], 4096   ;;  %p5272_p9 = pmov %p5261_p0 }
 0x152   : > { %v5021_v0 = vld [vmem:[%s1107_s7] sm:$0xff]  ;;  %v4535_v1 = vmov 128.0   ;;  %v3581_v15 = vld [vmem:[#allocation12 + $0x30] sm:$0xff]  ;;  %s5273_s11 = sld [smem:[#allocation42_spill]]  ;;  %vm1586_vm4 = vcmask 261120   ;;  %s4536_s22 = smov 64  }
 0x153   : > { %4468 = vsyncadd (%p5272_p9), [#allocation25], 4294963200  ;;  %1303 = vadd.xlane.f32.xlu0 %v5021_v0  ;;  %3903 = vrcp.f32 %v4535_v1  ;;  %v3582_v2 = vld [vmem:[#allocation12 + $0x38] sm:$0xff]  ;;  %v3589_v16 = vld [vmem:[#allocation14 + $0x30] sm:$0xff]  ;;  %s5274_s28 = sld [smem:[#allocation43_spill]]  ;;  %s4537_s4 = smov 96  }
 0x154   : > { %v3590_v3 = vld [vmem:[#allocation14 + $0x38] sm:$0xff]  ;;  %1407 = vmatpush.bf16.msra.mxu0 %v3582_v2  ;;  %v3597_v17 = vld [vmem:[#allocation15 + $0x30] sm:$0xff]  ;;  %v3580_v18 = vld [vmem:[#allocation12 + $0x28] sm:$0xff]  ;;  %s5275_s9 = sld [smem:[#allocation45_spill]]  ;;  %vm1622_vm5 = vcmask 1043456   ;;  %s4538_s14 = smov 32  }
 0x155   : > { %v3598_v4 = vld [vmem:[#allocation15 + $0x38] sm:$0xff]  ;;  %1488 = vmatpush.bf16.msra.mxu1 %v3590_v3  ;;  %v3588_v19 = vld [vmem:[#allocation14 + $0x28] sm:$0xff]  ;;  %v3579_v21 = vld [vmem:[#allocation12 + $0x20] sm:$0xff]  ;;  %vm1606_vm10 = vcmask 64512   ;;  %vm1640_vm11 = vcmask 257024   ;;  %s5276_s6 = sld [smem:[#allocation46_spill]] }
 0x156   : > { %1569 = vmatpush.bf16.msra.mxu2 %v3598_v4  ;;  %v3596_v20 = vld [vmem:[#allocation15 + $0x28] sm:$0xff]  ;;  %v3587_v22 = vld [vmem:[#allocation14 + $0x20] sm:$0xff]  ;;  %v3578_v24 = vld [vmem:[#allocation12 + $0x18] sm:$0xff]  ;;  %vm1712_vm12 = vcmask 519424   ;;  %vm1775_vm13 = vcmask 781824   ;;  %vm1838_vm14 = vcmask 1044224  }
 0x157   : > { %v3595_v23 = vld [vmem:[#allocation15 + $0x20] sm:$0xff]  ;;  %v3586_v25 = vld [vmem:[#allocation14 + $0x18] sm:$0xff]  ;;  %v3577_v27 = vld [vmem:[#allocation12 + $0x10] sm:$0xff]  ;;  %s5277_s1 = sld [smem:[#allocation47_spill]]  ;;  %p1280_p0 = scmp.lt.s32.totalorder %s4725_s23, 1 }
 0x158   : > { %1408 = vmatpush.bf16.msra.mxu0 %v3581_v15  ;;  %v3594_v26 = vld [vmem:[#allocation15 + $0x18] sm:$0xff]  ;;  %v3585_v28 = vld [vmem:[#allocation14 + $0x10] sm:$0xff]  ;;  %v3576_v30 = vld [vmem:[#allocation12 + $0x8] sm:$0xff]  ;;  %s5278_s20 = sld [smem:[#allocation48_spill]] }
 0x159   : > { %v3904_v5 = vpop.eup %3903  ;;  %1489 = vmatpush.bf16.msra.mxu1 %v3589_v16  ;;  %v3593_v29 = vld [vmem:[#allocation15 + $0x10] sm:$0xff]  ;;  %v3584_v31 = vld [vmem:[#allocation14 + $0x8] sm:$0xff]  ;;  %v3575_v33 = vld [vmem:[#allocation12] sm:$0xff]  ;;  %s5279_s3 = sld [smem:[#allocation51_spill]] }
 0x15a   : > { %v1306_v6 = vmul.f32 128.0, %v3904_v5  ;;  %vm1310_vm0 = vweird.f32 %v3904_v5  ;;  %1570 = vmatpush.bf16.msra.mxu2 %v3597_v17  ;;  %v3592_v32 = vld [vmem:[#allocation15 + $0x8] sm:$0xff]  ;;  %v3583_v34 = vld [vmem:[#allocation14] sm:$0xff]  ;;  %v3888_v43 = vld [vmem:[#allocation9] ss:$0 sm:$0xff]  ;;  %s5280_s7 = sld [smem:[#allocation50_spill]] }
 0x15b   : > { %v3591_v35 = vld [vmem:[#allocation15] sm:$0xff]  ;;  %v3889_v47 = vld [vmem:[#allocation11] ss:$0 sm:$0xff]  ;;  %v3890_v52 = vld [vmem:[%s5273_s11] ss:$0 sm:$0xff]  ;;  %s5281_s19 = sld [smem:[#allocation39_spill]] }
 0x15c   : > { %v1307_v7 = vsub.f32 1.0, %v1306_v6  ;;  %1409 = vmatpush.bf16.msra.mxu0 %v3580_v18  ;;  %v3891_v53 = vld [vmem:[%s5274_s28] ss:$0 sm:$0xff]  ;;  %v1286_v18 = vlaneseq  ;;  %s1281_s26 = scalar_select %p1280_p0, %s4725_s23, 1 }
 0x15d   : > { %1490 = vmatpush.bf16.msra.mxu1 %v3588_v19  ;;  %v3892_v60 = vld [vmem:[%s5275_s9] ss:$0 sm:$0xff]  ;;  %v4539_v19 = vmov 0   ;;  %s5283_s11 = sld [smem:[#allocation55_spill]] }
 0x15e   : > { %v1308_v8 = vmul.f32 %v3904_v5, %v1307_v7  ;;  %1571 = vmatpush.bf16.msra.mxu2 %v3596_v20  ;;  %v1291_v17 = vld [vmem:[%s1126_s27] sm:$0x1]  ;;  %s5282_s27 = sld [smem:[#allocation53_spill]] }
 0x15f   : > { %vm1292_vm6 = vcmp.ne.s32.totalorder %v1291_v17, 0  ;;  %s5284_s28 = sld [smem:[#allocation56_spill]] }
 0x160   : > { %v1309_v9 = vadd.f32 %v3904_v5, %v1308_v8  ;;  %1410 = vmatpush.bf16.msra.mxu0 %v3579_v21  ;;  %v1293_v20 = vsel %vm1292_vm6, 1, %v4539_v19  ;;  %s5285_s9 = sld [smem:[#allocation57_spill]] }
 0x161   : > { %1491 = vmatpush.bf16.msra.mxu1 %v3587_v22  ;;  %v1287_v22 = vshrl.u32 %v1286_v18, 7 }
 0x162   : > { %v5024_v10 = vsel %vm1310_vm0, %v3904_v5, %v1309_v9  ;;  %1572 = vmatpush.bf16.msra.mxu2 %v3595_v23  ;;  %v1289_v23 = vand.u32 127, %v1286_v18 }
 0x164   : > { %1411 = vmatpush.bf16.msra.mxu0 %v3578_v24  ;;  %v1294_v24 = vperm.slane %v1293_v20, 0  ;;  %vm1290_vm7 = vcmp.ge.s32.totalorder %v1287_v22, %v1289_v23 }
 0x165   : > { %1492 = vmatpush.bf16.msra.mxu1 %v3586_v25  ;;  %v4540_v25 = vmov -1e+09  }
 0x166   : > { %1573 = vmatpush.bf16.msra.mxu2 %v3594_v26  ;;  %vm1295_vm8 = vcmp.eq.s32.totalorder %v1294_v24, 1 }
 0x167   : > { %vm1296_vm9 = vmand %vm1290_vm7, %vm1295_vm8 }
 0x168   : > { %1412 = vmatpush.bf16.msra.mxu0 %v3577_v27  ;;  %v1297_v26 = vsel %vm1296_vm9, 0.0, %v4540_v25 }
 0x169   : > { %1493 = vmatpush.bf16.msra.mxu1 %v3585_v28 }
 0x16a   : > { %1574 = vmatpush.bf16.msra.mxu2 %v3593_v29 }
 0x16c   : > { %1413 = vmatpush.bf16.msra.mxu0 %v3576_v30 }
 0x16d   : > { %1494 = vmatpush.bf16.msra.mxu1 %v3584_v31 }
 0x16e   : > { %1575 = vmatpush.bf16.msra.mxu2 %v3592_v32 }
 0x170   : > { %1414 = vmatpush.bf16.msra.mxu0 %v3575_v33 }
 0x171   : > { %1495 = vmatpush.bf16.msra.mxu1 %v3583_v34 }
 0x172   : > { %1576 = vmatpush.bf16.msra.mxu2 %v3591_v35 }
 0x1c6   : > { %v1304_v11 = vpop.xlane.xlu0 %1303 }
 0x1c7   : > { %v1312_v12 = vmul.f32 %v5024_v10, %v1304_v11 }
 0x1c9   : > { %v1313_v13 = vsub.f32 %v5021_v0, %v1312_v12 }
 0x1cb   : > { %v1314_v14 = vmul.f32 %v1313_v13, %v1313_v13  ;;  %v1321_v46 = vmul.f32 %v3888_v43, %v1313_v13 }
 0x1cd   : > { %1315 = vadd.xlane.f32.xlu0 %v1314_v14 }
 0x240   : > { %v1316_v36 = vpop.xlane.xlu0 %1315 }
 0x241   : > { %v1317_v37 = vmul.f32 0.007874016, %v1316_v36 }
 0x243   : > { %v1322_v38 = vadd.f32 1e-06, %v1317_v37 }
 0x245   : > { %3905 = vrsqrt.f32 %v1322_v38  ;;  %vm1329_vm2 = vweird.f32 %v1322_v38 }
 0x24b   : > { %v3906_v39 = vpop.eup %3905 }
 0x24c   : > { %v1324_v40 = vmul.f32 %v3906_v39, %v1322_v38  ;;  %vm1330_vm1 = vweird.f32 %v3906_v39 }
 0x24d   : > { %vm1331_vm3 = vmor %vm1329_vm2, %vm1330_vm1 }
 0x24e   : > { %v1325_v41 = vmul.f32 %v3906_v39, %v1324_v40 }
 0x250   : > { %v1326_v42 = vmul.f32 0.5, %v1325_v41 }
 0x252   : > { %v1327_v44 = vsub.f32 1.5, %v1326_v42 }
 0x254   : > { %v1328_v45 = vmul.f32 %v3906_v39, %v1327_v44 }
 0x256   : > { %v1332_v48 = vsel %vm1331_vm3, %v3906_v39, %v1328_v45 }
 0x257   : > { %v1333_v49 = vmul.f32 %v1332_v48, %v1321_v46 }
 0x259   : > { %v1337_v50 = vadd.f32 %v3889_v47, %v1333_v49 }
 0x25b   : > { %v1338_v51 = vpack.c.bf16 %v1337_v50, %v1337_v50 }
 0x25d   : > { %1415 = vmatmul.bf16.vlgmr.msra.gmra.mxu0 %v1338_v51  ;;  %1496 = vmatmul.bf16.vlgmr.msra.gmra.mxu1 %v1338_v51 }
 0x25e   : > { %1577 = vmatmul.bf16.vlgmr.msra.gmra.mxu2 %v1338_v51 }
 0x2da   : > { %v1416_v54 = vpop.f32.mrf.mxu0  ;;  %v1497_v55 = vpop.f32.mrf.mxu1 }
 0x2db   : > { %v1417_v56 = vadd.f32 %v3890_v52, %v1416_v54  ;;  %v1498_v57 = vadd.f32 %v3891_v53, %v1497_v55 }
 0x2dd   : > { %v1582_v58 = vmul.f32 0.17677669, %v1417_v56  ;;  %v1584_v59 = vpack.c.bf16 %v1498_v57, %v1498_v57 }
 0x2df   : > { %v1648_v61 = vunpack.c.l.b16 %v1584_v59  ;;  %v1591_v62 = vsel %vm1586_vm4, %v1584_v59, 0  ;;  %v1583_v63 = vpack.c.bf16 %v1582_v58, %v1582_v58 }
 0x2e0   : > { %1600 = vmatpush.bf16.xpose.msra.mxu3 %v1591_v62 }
 0x2e1   : > { %v5032_v1 = vpack.c.b16 %v1648_v61, %v1648_v61  ;;  %v1578_v2 = vpop.f32.mrf.mxu2  ;;  %v1643_v7 = vunpack.c.l.b16 %v1583_v63 }
 0x2e2   : > { %v1579_v3 = vadd.f32 %v3892_v60, %v1578_v2  ;;  %v1418_v4 = vpop.f32.mrf.mxu0  ;;  %v1499_v5 = vpop.f32.mrf.mxu1 }
 0x2e3   : > { %1716 = vrot.lane.b32.xlu0 %v5032_v1, %s4536_s22  ;;  %1650 = vrot.lane.b32.xlu2 %v5032_v1, %s4537_s4  ;;  %v1644_v11 = vpack.c.b16 %v1643_v7, %v1643_v7 }
 0x2e4   : > { %v1585_v6 = vpack.c.bf16 %v1579_v3, %v1579_v3 }
 0x2e6   : > { %v1624_v8 = vsel %vm1622_vm5, %v1585_v6, 0  ;;  %v1684_v40 = vunpack.c.l.b16 %v1585_v6 }
 0x2e7   : > { %3267 = vmatmul.msk.bf16.vlgmr.msra.gmra.mxu3 %vm1586_vm4, %v1583_v63 }
 0x2e8   : > { %1633 = vmatpush.bf16.msrb.mxu3 %v1624_v8  ;;  %v1685_v41 = vpack.c.b16 %v1684_v40, %v1684_v40  ;;  %v3604_v40 = vld [vmem:[#allocation17 + $0x28] sm:$0xff] }
 0x2e9   : > { %v1580_v9 = vpop.f32.mrf.mxu2 }
 0x2eb   : > { %1645 = vrot.lane.b32.xlu2 %v1644_v11, %s4537_s4 }
 0x2f3   : > { %1714 = vrot.lane.b32.xlu2 %v1644_v11, %s4536_s22 }
 0x2fb   : > { %1777 = vrot.lane.b32.xlu2 %v1644_v11, %s4538_s14 }
 0x33d   : > { %v1651_v12 = vpop.permute.xlu2 %1650 }
 0x33e   : > { %v1656_v13 = vsel %vm1586_vm4, %v1651_v12, 0 }
 0x33f   : > { %1665 = vmatpush.bf16.xpose.msra.mxu3 %v1656_v13 }
 0x345   : > { %v1646_v14 = vpop.permute.xlu2 %1645 }
 0x34d   : > { %v1715_v21 = vpop.permute.xlu2 %1714 }
 0x355   : > { %v1717_v15 = vpop.permute.xlu0 %1716  ;;  %v1778_v51 = vpop.permute.xlu2 %1777 }
 0x356   : > { %v1722_v16 = vsel %vm1586_vm4, %v1717_v15, 0 }
 0x357   : > { %1731 = vmatpush.bf16.xpose.msrb.mxu2 %v1722_v16 }
 0x35e   : > { %3271 = vmatmul.msk.bf16.vlgmr.msrb.gmra.mxu2 %vm1586_vm4, %v1715_v21 }
 0x36a   : > { %v1602_v27 = vpop.f32.mrf.mxu3 }
 0x36b   : > { %v1603_v28 = vadd.f32 %v1602_v27, %v1297_v26 }
 0x36d   : > { %v1607_v29 = vsel %vm1606_vm10, %v1603_v28, -inf }
 0x36e   : > { %1608 = vmax.xlane.f32.xlu1 %v1607_v29 }
 0x372   : > { %v1604_v30 = vpop.f32.mrf.mxu3 }
 0x3e1   : > { %v1733_v31 = vpop.f32.mrf.mxu2  ;;  %v1609_v33 = vpop.xlane.xlu1 %1608 }
 0x3e2   : > { %v1734_v32 = vadd.f32 %v1733_v31, %v1297_v26  ;;  %v1610_v34 = vsub.f32 %v1603_v28, %v1609_v33 }
 0x3e4   : > { %v1737_v35 = vsel %vm1606_vm10, %v1734_v32, -inf  ;;  %v1611_v36 = vmul.f32 1.442695, %v1610_v34 }
 0x3e5   : > { %1738 = vmax.xlane.f32.xlu0 %v1737_v35 }
 0x3e6   : > { %3907 = vpow2.f32 %v1611_v36 }
 0x3e9   : > { %v1735_v37 = vpop.f32.mrf.mxu2 }
 0x3ea   : > { %v3606_v37 = vld [vmem:[#allocation17 + $0x38] sm:$0xff] }
 0x3eb   : > { %1909 = vmatpush.bf16.msrb.mxu1 %v3606_v37 }
 0x3ec   : > { %v3908_v38 = vpop.eup %3907 }
 0x3ed   : > { %v1613_v39 = vsel %vm1606_vm10, %v3908_v38, 0.0 }
 0x3ee   : > { %1614 = vadd.xlane.f32.xlu1 %v1613_v39 }
 0x3f9   : > { %1686 = vrot.lane.b32.xlu0 %v1685_v41, %s4537_s4 }
 0x407   : > { %1779 = vrot.lane.b32.xlu1 %v5032_v1, %s4538_s14 }
 0x458   : > { %v1739_v43 = vpop.xlane.xlu0 %1738 }
 0x459   : > { %v1740_v55 = vsub.f32 %v1734_v32, %v1739_v43 }
 0x45b   : > { %v1741_v56 = vmul.f32 1.442695, %v1740_v55 }
 0x461   : > { %v1615_v42 = vpop.xlane.xlu1 %1614 }
 0x462   : > { %3909 = vrcp.f32 %v1615_v42 }
 0x463   : > { %3911 = vpow2.f32 %v1741_v56 }
 0x468   : > { %v3910_v44 = vpop.eup %3909 }
 0x469   : > { %v1617_v45 = vmul.f32 %v3910_v44, %v3908_v38  ;;  %v3912_v60 = vpop.eup %3911  ;;  %v3605_v38 = vld [vmem:[#allocation17 + $0x30] sm:$0xff] }
 0x46a   : > { %v1743_v62 = vsel %vm1606_vm10, %v3912_v60, 0.0  ;;  %1910 = vmatpush.bf16.msrb.mxu1 %v3605_v38 }
 0x46b   : > { %v1687_v46 = vpop.permute.xlu0 %1686  ;;  %v1618_v47 = vpack.c.bf16 %v1617_v45, %v1617_v45  ;;  %v3602_v45 = vld [vmem:[#allocation17 + $0x18] sm:$0xff] }
 0x46c   : > { %v1692_v48 = vsel %vm1622_vm5, %v1687_v46, 0  ;;  %v3601_v46 = vld [vmem:[#allocation17 + $0x10] sm:$0xff] }
 0x46d   : > { %1701 = vmatpush.bf16.msrb.mxu0 %v1692_v48  ;;  %3268 = vmatmul.msk.bf16.vlgmr.msrb.gmra.mxu3 %vm1606_vm10, %v1618_v47  ;;  %v3600_v47 = vld [vmem:[#allocation17 + $0x8] sm:$0xff]  ;;  %v3599_v48 = vld [vmem:[#allocation17] sm:$0xff] }
 0x46e   : > { %1911 = vmatpush.bf16.msrb.mxu1 %v3604_v40 }
 0x479   : > { %v1780_v49 = vpop.permute.xlu1 %1779 }
 0x47a   : > { %v1785_v50 = vsel %vm1586_vm4, %v1780_v49, 0 }
 0x47b   : > { %1794 = vmatpush.bf16.xpose.msrb.mxu3 %v1785_v50 }
 0x47d   : > { %3269 = vmatmul.msk.bf16.vlgmr.msra.gmra.mxu3 %vm1586_vm4, %v1646_v14 }
 0x48d   : > { %3273 = vmatmul.msk.bf16.vlgmr.msrb.gmra.mxu3 %vm1586_vm4, %v1778_v51 }
 0x4f0   : > { %v1635_v52 = vpop.f32.mrf.mxu3 }
 0x4f1   : > { %v1639_v53 = vpack.c.bf16 %v1635_v52, %v1635_v52 }
 0x4f3   : > { %1641 = vst.msk [vmem:[#allocation2] sm:$0xf] %vm1640_vm11, %v1639_v53  ;;  %v3893_v53 = vld [vmem:[%s5276_s6] ss:$0 sm:$0xff]  ;;  %s3572_s6 = sshll.u32 %s4725_s23, 3  ;;  %s2859_s23 = scalar_lea.sflag [#allocation5], %s4979_s18 }
 0x4f8   : > { %v1637_v54 = vpop.f32.mrf.mxu3 }
 0x500   : > { %v1667_v57 = vpop.f32.mrf.mxu3 }
 0x501   : > { %v1668_v58 = vadd.f32 %v1667_v57, %v1297_v26 }
 0x503   : > { %v1671_v59 = vsel %vm1606_vm10, %v1668_v58, -inf }
 0x504   : > { %1672 = vmax.xlane.f32.xlu2 %v1671_v59  ;;  %v3621_v59 = vld [vmem:[#allocation20 + $0x30] sm:$0xff] }
 0x508   : > { %v1669_v61 = vpop.f32.mrf.mxu3 }
 0x509   : > { %v3620_v61 = vld [vmem:[#allocation20 + $0x28] sm:$0xff] }
 0x50c   : > { %1744 = vadd.xlane.f32.xlu2 %v1743_v62  ;;  %v3619_v62 = vld [vmem:[#allocation20 + $0x20] sm:$0xff] }
 0x510   : > { %v1796_v63 = vpop.f32.mrf.mxu3 }
 0x511   : > { %v1797_v1 = vadd.f32 %v1796_v63, %v1297_v26  ;;  %v3618_v63 = vld [vmem:[#allocation20 + $0x18] sm:$0xff] }
 0x513   : > { %v1800_v2 = vsel %vm1606_vm10, %v1797_v1, -inf }
 0x514   : > { %1801 = vmax.xlane.f32.xlu1 %v1800_v2 }
 0x518   : > { %v1798_v3 = vpop.f32.mrf.mxu3 }
 0x577   : > { %v1673_v4 = vpop.xlane.xlu2 %1672 }
 0x578   : > { %v1674_v5 = vsub.f32 %v1668_v58, %v1673_v4  ;;  %v3622_v58 = vld [vmem:[#allocation20 + $0x38] sm:$0xff] }
 0x579   : > { %2104 = vmatpush.bf16.msra.mxu3 %v3622_v58 }
 0x57a   : > { %v1675_v6 = vmul.f32 1.442695, %v1674_v5 }
 0x57c   : > { %3913 = vpow2.f32 %v1675_v6  ;;  %v3613_v6 = vld [vmem:[#allocation18 + $0x30] sm:$0xff] }
 0x57d   : > { %2105 = vmatpush.bf16.msra.mxu3 %v3621_v59  ;;  %v3629_v59 = vld [vmem:[#allocation21 + $0x30] sm:$0xff] }
 0x57f   : > { %v1745_v15 = vpop.xlane.xlu2 %1744 }
 0x581   : > { %2106 = vmatpush.bf16.msra.mxu3 %v3620_v61 }
 0x582   : > { %v3914_v7 = vpop.eup %3913 }
 0x583   : > { %v1677_v8 = vsel %vm1606_vm10, %v3914_v7, 0.0 }
 0x584   : > { %1678 = vadd.xlane.f32.xlu2 %v1677_v8  ;;  %v3612_v8 = vld [vmem:[#allocation18 + $0x28] sm:$0xff] }
 0x585   : > { %2107 = vmatpush.bf16.msra.mxu3 %v3619_v62  ;;  %v3627_v62 = vld [vmem:[#allocation21 + $0x20] sm:$0xff] }
 0x587   : > { %v1802_v9 = vpop.xlane.xlu1 %1801 }
 0x588   : > { %v1803_v11 = vsub.f32 %v1797_v1, %v1802_v9  ;;  %v3617_v1 = vld [vmem:[#allocation20 + $0x10] sm:$0xff] }
 0x589   : > { %2108 = vmatpush.bf16.msra.mxu3 %v3618_v63  ;;  %v1285_v9 = vld [vmem:[%s1117_s21] sm:$0xff]  ;;  %s1282_s21 = scalar_lea.vmem %s5281_s19, %s1281_s26 }
 0x58a   : > { %v1804_v12 = vmul.f32 1.442695, %v1803_v11  ;;  %v5088_v11 = vpack.c.bf16 %v1285_v9, %v1285_v9  ;;  %v1298_v63 = vld [vmem:[%s1282_s21] sm:$0x1] }
 0x58b   : > { %vm1299_vm2 = vcmp.ne.s32.totalorder %v1298_v63, 0 }
 0x58c   : > { %3915 = vpow2.f32 %v1804_v12  ;;  %v3611_v12 = vld [vmem:[#allocation18 + $0x20] sm:$0xff] }
 0x58d   : > { %3917 = vrcp.f32 %v1745_v15  ;;  %2109 = vmatpush.bf16.msra.mxu3 %v3617_v1  ;;  %v3608_v15 = vld [vmem:[#allocation18 + $0x8] sm:$0xff]  ;;  %v3626_v1 = vld [vmem:[#allocation21 + $0x18] sm:$0xff] }
 0x592   : > { %v3916_v13 = vpop.eup %3915 }
 0x593   : > { %v1806_v14 = vsel %vm1606_vm10, %v3916_v13, 0.0  ;;  %v3918_v17 = vpop.eup %3917 }
 0x594   : > { %1807 = vadd.xlane.f32.xlu1 %v1806_v14  ;;  %v1747_v19 = vmul.f32 %v3918_v17, %v3912_v60  ;;  %v3614_v60 = vld [vmem:[#allocation18 + $0x38] sm:$0xff]  ;;  %v3609_v14 = vld [vmem:[#allocation18 + $0x10] sm:$0xff] }
 0x596   : > { %v1748_v24 = vpack.c.bf16 %v1747_v19, %v1747_v19 }
 0x59c   : > { %1749 = vrot.lane.b32.xlu2 %v1685_v41, %s4536_s22 }
 0x5ad   : > { %1812 = vrot.lane.b32.xlu1 %v1685_v41, %s4538_s14  ;;  %v3603_v41 = vld [vmem:[#allocation17 + $0x20] sm:$0xff] }
 0x5ae   : > { %1912 = vmatpush.bf16.msrb.mxu1 %v3603_v41 }
 0x5b2   : > { %1913 = vmatpush.bf16.msrb.mxu1 %v3602_v45 }
 0x5b6   : > { %1914 = vmatpush.bf16.msrb.mxu1 %v3601_v46 }
 0x5ba   : > { %1915 = vmatpush.bf16.msrb.mxu1 %v3600_v47 }
 0x5be   : > { %1916 = vmatpush.bf16.msrb.mxu1 %v3599_v48 }
 0x5f7   : > { %v1679_v16 = vpop.xlane.xlu2 %1678 }
 0x5f8   : > { %3919 = vrcp.f32 %v1679_v16  ;;  %v3607_v16 = vld [vmem:[#allocation18] sm:$0xff] }
 0x5fe   : > { %v3920_v18 = vpop.eup %3919 }
 0x5ff   : > { %v1681_v20 = vmul.f32 %v3920_v18, %v3914_v7  ;;  %v1750_v21 = vpop.permute.xlu2 %1749  ;;  %v3615_v7 = vld [vmem:[#allocation20] sm:$0xff] }
 0x600   : > { %v1755_v22 = vsel %vm1622_vm5, %v1750_v21, 0 }
 0x601   : > { %1764 = vmatpush.bf16.msra.mxu2 %v1755_v22  ;;  %v1682_v23 = vpack.c.bf16 %v1681_v20, %v1681_v20 }
 0x603   : > { %3270 = vmatmul.msk.bf16.vlgmr.msrb.gmra.mxu0 %vm1606_vm10, %v1682_v23 }
 0x604   : > { %3272 = vmatmul.msk.bf16.vlgmr.msra.gmra.mxu2 %vm1606_vm10, %v1748_v24  ;;  %v3894_v24 = vld [vmem:[%s5277_s1] ss:$0 sm:$0xff] }
 0x605   : > { %2023 = vmatpush.bf16.msrb.mxu2 %v3614_v60  ;;  %v3628_v60 = vld [vmem:[#allocation21 + $0x28] sm:$0xff] }
 0x607   : > { %v1808_v26 = vpop.xlane.xlu1 %1807 }
 0x608   : > { %3921 = vrcp.f32 %v1808_v26 }
 0x609   : > { %2024 = vmatpush.bf16.msrb.mxu2 %v3613_v6 }
 0x60d   : > { %2025 = vmatpush.bf16.msrb.mxu2 %v3612_v8  ;;  %v3623_v8 = vld [vmem:[#allocation21] sm:$0xff] }
 0x60e   : > { %v3922_v27 = vpop.eup %3921 }
 0x60f   : > { %v1810_v28 = vmul.f32 %v3922_v27, %v3916_v13  ;;  %v3610_v13 = vld [vmem:[#allocation18 + $0x18] sm:$0xff] }
 0x611   : > { %v1811_v31 = vpack.c.bf16 %v1810_v28, %v1810_v28  ;;  %2026 = vmatpush.bf16.msrb.mxu2 %v3611_v12 }
 0x615   : > { %2027 = vmatpush.bf16.msrb.mxu2 %v3610_v13 }
 0x619   : > { %2028 = vmatpush.bf16.msrb.mxu2 %v3609_v14 }
 0x61d   : > { %2029 = vmatpush.bf16.msrb.mxu2 %v3608_v15 }
 0x61f   : > { %v1813_v29 = vpop.permute.xlu1 %1812 }
 0x620   : > { %v1818_v30 = vsel %vm1622_vm5, %v1813_v29, 0  ;;  %v3895_v29 = vld [vmem:[%s5278_s20] ss:$0 sm:$0xff]  ;;  %s1279_s20 = scalar_lea.vmem [#allocation27], %s4982_s10 }
 0x621   : > { %1827 = vmatpush.bf16.msra.mxu0 %v1818_v30  ;;  %2030 = vmatpush.bf16.msrb.mxu2 %v3607_v16 }
 0x624   : > { %3274 = vmatmul.msk.bf16.vlgmr.msra.gmra.mxu0 %vm1606_vm10, %v1811_v31 }
 0x680   : > { %v1703_v32 = vpop.f32.mrf.mxu0 }
 0x681   : > { %v1707_v33 = vpack.c.bf16 %v1703_v32, %v1703_v32 }
 0x683   : > { %1709 = vrot.lane.b32.xlu0 %v1707_v33, %s4538_s14 }
 0x687   : > { %v1766_v34 = vpop.f32.mrf.mxu2 }
 0x688   : > { %v1770_v35 = vpack.c.bf16 %v1766_v34, %v1766_v34  ;;  %v1705_v36 = vpop.f32.mrf.mxu0  ;;  %v3896_v34 = vld [vmem:[%s5279_s3] ss:$0 sm:$0xff]  ;;  %s2871_s3 = sshll.u32 %s1279_s20, 4  ;;  %s2872_s3 = int_to_ptr.vmem [resolvable:$true] %s2871_s3 }
 0x68b   : > { %1772 = vrot.lane.b32.xlu0 %v1770_v35, %s4536_s22 }
 0x68f   : > { %v1768_v39 = vpop.f32.mrf.mxu2 }
 0x6a1   : > { %v1829_v42 = vpop.f32.mrf.mxu0 }
 0x6a2   : > { %v1833_v43 = vpack.c.bf16 %v1829_v42, %v1829_v42  ;;  %v3897_v42 = vld [vmem:[%s5280_s7] ss:$0 sm:$0xff] }
 0x6a4   : > { %1835 = vrot.lane.b32.xlu2 %v1833_v43, %s4537_s4 }
 0x6a9   : > { %v1831_v44 = vpop.f32.mrf.mxu0 }
 0x6f5   : > { %v1710_v49 = vpop.permute.xlu0 %1709 }
 0x6f6   : > { %1713 = vst.msk [vmem:[#allocation2] sm:$0xf] %vm1712_vm12, %v1710_v49 }
 0x6fd   : > { %v1773_v50 = vpop.permute.xlu0 %1772 }
 0x6fe   : > { %1776 = vst.msk [vmem:[#allocation2] sm:$0xf] %vm1775_vm13, %v1773_v50  ;;  %v1836_v51 = vpop.permute.xlu2 %1835 }
 0x6ff   : > { %1839 = vst.msk [vmem:[#allocation2] sm:$0xf] %vm1838_vm14, %v1836_v51 }
 0x706   : > { %v1840_v52 = vld [vmem:[#allocation2] sm:$0xf] }
 0x707   : > { %1917 = vmatmul.bf16.vlgmr.msrb.gmra.mxu1 %v1840_v52 }
 0x784   : > { %v1918_v54 = vpop.f32.mrf.mxu1 }
 0x785   : > { %v1919_v55 = vadd.f32 %v3893_v53, %v1918_v54 }
 0x787   : > { %v5081_v56 = vadd.f32 %v1919_v55, %v5021_v0  ;;  %v3616_v0 = vld [vmem:[#allocation20 + $0x8] sm:$0xff]  ;;  %v3630_v55 = vld [vmem:[#allocation21 + $0x38] sm:$0xff] }
 0x788   : > { %2110 = vmatpush.bf16.msra.mxu3 %v3616_v0  ;;  %2185 = vmatpush.bf16.msrb.mxu0 %v3630_v55 }
 0x789   : > { %1925 = vadd.xlane.f32.xlu0 %v5081_v56 }
 0x78c   : > { %v1920_v57 = vpop.f32.mrf.mxu1  ;;  %2111 = vmatpush.bf16.msra.mxu3 %v3615_v7  ;;  %2186 = vmatpush.bf16.msrb.mxu0 %v3629_v59 }
 0x78f   : > { %2112 = vmatmul.bf16.vlgmr.msra.gmra.mxu3 %v5088_v11 }
 0x790   : > { %2187 = vmatpush.bf16.msrb.mxu0 %v3628_v60 }
 0x794   : > { %2188 = vmatpush.bf16.msrb.mxu0 %v3627_v62 }
 0x798   : > { %2189 = vmatpush.bf16.msrb.mxu0 %v3626_v1 }
 0x7fc   : > { %v1926_v2 = vpop.xlane.xlu0 %1925 }
 0x7fd   : > { %v1927_v3 = vmul.f32 %v1926_v2, %v5024_v10  ;;  %v1300_v2 = vsel %vm1299_vm2, 0.0, %v4540_v25 }
 0x7ff   : > { %v1928_v4 = vsub.f32 %v5081_v56, %v1927_v3  ;;  %v3625_v3 = vld [vmem:[#allocation21 + $0x10] sm:$0xff] }
 0x800   : > { %2190 = vmatpush.bf16.msrb.mxu0 %v3625_v3 }
 0x801   : > { %v1929_v5 = vmul.f32 %v1928_v4, %v1928_v4  ;;  %v1936_v28 = vmul.f32 %v3894_v24, %v1928_v4  ;;  %v2203_v4 = vperm.slane %v1300_v2, 0 }
 0x803   : > { %1930 = vadd.xlane.f32.xlu1 %v1929_v5  ;;  %v3624_v5 = vld [vmem:[#allocation21 + $0x8] sm:$0xff] }
 0x804   : > { %2191 = vmatpush.bf16.msrb.mxu0 %v3624_v5 }
 0x808   : > { %2192 = vmatpush.bf16.msrb.mxu0 %v3623_v8 }
 0x80b   : > { %2193 = vmatmul.bf16.vlgmr.msrb.gmra.mxu0 %v5088_v11 }
 0x812   : > { %v2113_v35 = vpop.f32.mrf.mxu3 }
 0x813   : > { %v2114_v36 = vadd.f32 %v3896_v34, %v2113_v35 }
 0x815   : > { %v2200_v37 = vpack.c.bf16 %v2114_v36, %v2114_v36 }
 0x817   : > { %v2209_v38 = vsel %vm1586_vm4, %v2200_v37, 0  ;;  %v2263_v39 = vunpack.c.l.b16 %v2200_v37 }
 0x818   : > { %2218 = vmatpush.bf16.xpose.msra.mxu1 %v2209_v38 }
 0x819   : > { %v2264_v40 = vpack.c.b16 %v2263_v39, %v2263_v39 }
 0x81a   : > { %v2115_v41 = vpop.f32.mrf.mxu3 }
 0x81b   : > { %2265 = vrot.lane.b32.xlu2 %v2264_v40, %s4537_s4 }
 0x823   : > { %2330 = vrot.lane.b32.xlu2 %v2264_v40, %s4536_s22 }
 0x875   : > { %v2266_v50 = vpop.permute.xlu2 %2265 }
 0x876   : > { %v1931_v17 = vpop.xlane.xlu1 %1930  ;;  %v2271_v51 = vsel %vm1586_vm4, %v2266_v50, 0 }
 0x877   : > { %v1932_v18 = vmul.f32 0.007874016, %v1931_v17  ;;  %2280 = vmatpush.bf16.xpose.msrb.mxu3 %v2271_v51 }
 0x879   : > { %v1937_v19 = vadd.f32 1e-06, %v1932_v18 }
 0x87b   : > { %3923 = vrsqrt.f32 %v1937_v19  ;;  %vm1944_vm0 = vweird.f32 %v1937_v19 }
 0x87d   : > { %v2331_v52 = vpop.permute.xlu2 %2330 }
 0x87e   : > { %v2336_v53 = vsel %vm1586_vm4, %v2331_v52, 0 }
 0x87f   : > { %2345 = vmatpush.bf16.xpose.msrb.mxu1 %v2336_v53 }
 0x881   : > { %v3924_v20 = vpop.eup %3923 }
 0x882   : > { %v1939_v21 = vmul.f32 %v3924_v20, %v1937_v19  ;;  %vm1945_vm15 = vweird.f32 %v3924_v20 }
 0x883   : > { %vm1946_vm1 = vmor %vm1944_vm0, %vm1945_vm15 }
 0x884   : > { %v1940_v22 = vmul.f32 %v3924_v20, %v1939_v21 }
 0x886   : > { %v1941_v23 = vmul.f32 0.5, %v1940_v22 }
 0x888   : > { %v1942_v26 = vsub.f32 1.5, %v1941_v23 }
 0x88a   : > { %v1943_v27 = vmul.f32 %v3924_v20, %v1942_v26 }
 0x88c   : > { %v1947_v30 = vsel %vm1946_vm1, %v3924_v20, %v1943_v27 }
 0x88d   : > { %v1948_v31 = vmul.f32 %v1947_v30, %v1936_v28  ;;  %v3898_v28 = vld [vmem:[%s5282_s27] ss:$0 sm:$0xff]  ;;  %v2194_v30 = vpop.f32.mrf.mxu0 }
 0x88f   : > { %v1952_v32 = vadd.f32 %v3895_v29, %v1948_v31  ;;  %v2195_v31 = vadd.f32 %v3898_v28, %v2194_v30  ;;  %v3633_v30 = vld [vmem:[#allocation23 + $0x10] sm:$0xff] }
 0x891   : > { %v1953_v33 = vpack.c.bf16 %v1952_v32, %v1952_v32  ;;  %v2201_v32 = vpack.c.bf16 %v2195_v31, %v2195_v31  ;;  %v3632_v31 = vld [vmem:[#allocation23 + $0x8] sm:$0xff] }
 0x893   : > { %2031 = vmatmul.bf16.vlgmr.msrb.gmra.mxu2 %v1953_v33  ;;  %v2240_v33 = vsel %vm1622_vm5, %v2201_v32, 0  ;;  %v2299_v35 = vunpack.c.l.b16 %v2201_v32  ;;  %v3631_v32 = vld [vmem:[#allocation23] sm:$0xff] }
 0x894   : > { %2249 = vmatpush.bf16.msra.mxu2 %v2240_v33 }
 0x895   : > { %v2196_v34 = vpop.f32.mrf.mxu0  ;;  %v2300_v36 = vpack.c.b16 %v2299_v35, %v2299_v35 }
 0x916   : > { %v2032_v43 = vpop.f32.mrf.mxu2 }
 0x917   : > { %v2033_v44 = vadd.f32 %v3897_v42, %v2032_v43 }
 0x919   : > { %v2198_v45 = vmul.f32 0.17677669, %v2033_v44 }
 0x91b   : > { %v2199_v46 = vpack.c.bf16 %v2198_v45, %v2198_v45 }
 0x91d   : > { %v2258_v47 = vunpack.c.l.b16 %v2199_v46  ;;  %3403 = vmatmul.msk.bf16.vlgmr.msra.gmra.mxu1 %vm1586_vm4, %v2199_v46 }
 0x91e   : > { %v2034_v48 = vpop.f32.mrf.mxu2 }
 0x91f   : > { %v2259_v49 = vpack.c.b16 %v2258_v47, %v2258_v47 }
 0x921   : > { %2390 = vrot.lane.b32.xlu0 %v2259_v49, %s4538_s14  ;;  %2260 = vrot.lane.b32.xlu2 %v2259_v49, %s4537_s4 }
 0x929   : > { %2392 = vrot.lane.b32.xlu2 %v2264_v40, %s4538_s14 }
 0x931   : > { %2328 = vrot.lane.b32.xlu2 %v2259_v49, %s4536_s22 }
 0x97b   : > { %v2261_v54 = vpop.permute.xlu2 %2260 }
 0x97c   : > { %3405 = vmatmul.msk.bf16.vlgmr.msrb.gmra.mxu3 %vm1586_vm4, %v2261_v54 }
 0x983   : > { %v2393_v57 = vpop.permute.xlu2 %2392 }
 0x984   : > { %v2398_v58 = vsel %vm1586_vm4, %v2393_v57, 0 }
 0x985   : > { %2407 = vmatpush.bf16.xpose.msra.mxu3 %v2398_v58 }
 0x98b   : > { %v2329_v61 = vpop.permute.xlu2 %2328 }
 0x98c   : > { %3407 = vmatmul.msk.bf16.vlgmr.msrb.gmra.mxu1 %vm1586_vm4, %v2329_v61 }
 0x993   : > { %v2391_v0 = vpop.permute.xlu0 %2390 }
 0x994   : > { %3409 = vmatmul.msk.bf16.vlgmr.msra.gmra.mxu3 %vm1586_vm4, %v2391_v0 }
 0x99a   : > { %v2220_v6 = vpop.f32.mrf.mxu1 }
 0x99b   : > { %v2221_v7 = vadd.f32 %v2220_v6, %v2203_v4 }
 0x99d   : > { %v2224_v9 = vsel %vm1606_vm10, %v2221_v7, -inf }
 0x99e   : > { %2225 = vmax.xlane.f32.xlu1 %v2224_v9 }
 0x9a2   : > { %v2222_v12 = vpop.f32.mrf.mxu1 }
 0x9ff   : > { %v2282_v13 = vpop.f32.mrf.mxu3 }
 0xa00   : > { %v2283_v25 = vadd.f32 %v2282_v13, %v2203_v4 }
 0xa02   : > { %v2286_v14 = vsel %vm1606_vm10, %v2283_v25, -inf }
 0xa03   : > { %2287 = vmax.xlane.f32.xlu2 %v2286_v14 }
 0xa07   : > { %v2284_v15 = vpop.f32.mrf.mxu3 }
 0xa09   : > { %v2347_v16 = vpop.f32.mrf.mxu1 }
 0xa0a   : > { %v2348_v17 = vadd.f32 %v2347_v16, %v2203_v4 }
 0xa0c   : > { %v2351_v18 = vsel %vm1606_vm10, %v2348_v17, -inf }
 0xa0d   : > { %2352 = vmax.xlane.f32.xlu1 %v2351_v18 }
 0xa11   : > { %v2226_v19 = vpop.xlane.xlu1 %2225  ;;  %v2349_v20 = vpop.f32.mrf.mxu1 }
 0xa12   : > { %v2227_v21 = vsub.f32 %v2221_v7, %v2226_v19 }
 0xa14   : > { %v2228_v22 = vmul.f32 1.442695, %v2227_v21 }
 0xa16   : > { %3925 = vpow2.f32 %v2228_v22 }
 0xa17   : > { %v2409_v23 = vpop.f32.mrf.mxu3 }
 0xa18   : > { %v2410_v24 = vadd.f32 %v2409_v23, %v2203_v4 }
 0xa1a   : > { %v2413_v11 = vsel %vm1606_vm10, %v2410_v24, -inf }
 0xa1b   : > { %2414 = vmax.xlane.f32.xlu1 %v2413_v11  ;;  %v3637_v11 = vld [vmem:[#allocation23 + $0x30] sm:$0xff] }
 0xa1c   : > { %v3926_v26 = vpop.eup %3925 }
 0xa1d   : > { %v2230_v27 = vsel %vm1606_vm10, %v3926_v26, 0.0 }
 0xa1e   : > { %2231 = vadd.xlane.f32.xlu0 %v2230_v27  ;;  %v3635_v27 = vld [vmem:[#allocation23 + $0x20] sm:$0xff] }
 0xa1f   : > { %v2411_v29 = vpop.f32.mrf.mxu3 }
 0xa20   : > { %v3634_v29 = vld [vmem:[#allocation23 + $0x18] sm:$0xff] }
 0xa32   : > { %2425 = vrot.lane.b32.xlu0 %v2300_v36, %s4538_s14 }
 0xa34   : > { %2301 = vrot.lane.b32.xlu1 %v2300_v36, %s4537_s4 }
 0xa76   : > { %v2288_v37 = vpop.xlane.xlu2 %2287 }
 0xa77   : > { %v2289_v38 = vsub.f32 %v2283_v25, %v2288_v37 }
 0xa79   : > { %v2290_v39 = vmul.f32 1.442695, %v2289_v38 }
 0xa7b   : > { %3927 = vpow2.f32 %v2290_v39 }
 0xa80   : > { %v2353_v40 = vpop.xlane.xlu1 %2352 }
 0xa81   : > { %v3928_v41 = vpop.eup %3927  ;;  %v2354_v42 = vsub.f32 %v2348_v17, %v2353_v40 }
 0xa82   : > { %v2292_v43 = vsel %vm1606_vm10, %v3928_v41, 0.0 }
 0xa83   : > { %v2355_v44 = vmul.f32 1.442695, %v2354_v42  ;;  %2293 = vadd.xlane.f32.xlu1 %v2292_v43  ;;  %v3654_v42 = vld [vmem:[#allocation24 + $0x74] sm:$0xf0]  ;;  %v3653_v43 = vld [vmem:[#allocation24 + $0x74] sm:$0xf] }
 0xa85   : > { %3929 = vpow2.f32 %v2355_v44 }
 0xa8b   : > { %v3930_v45 = vpop.eup %3929 }
 0xa8c   : > { %v2357_v46 = vsel %vm1606_vm10, %v3930_v45, 0.0 }
 0xa8d   : > { %2358 = vadd.xlane.f32.xlu2 %v2357_v46 }
 0xa8e   : > { %v2415_v47 = vpop.xlane.xlu1 %2414 }
 0xa8f   : > { %v2416_v48 = vsub.f32 %v2410_v24, %v2415_v47  ;;  %v3638_v24 = vld [vmem:[#allocation23 + $0x38] sm:$0xff] }
 0xa90   : > { %2521 = vmatpush.bf16.msra.mxu1 %v3638_v24  ;;  %v3640_v24 = vld [vmem:[#allocation24 + $0x4] sm:$0xf0] }
 0xa91   : > { %v2417_v49 = vmul.f32 1.442695, %v2416_v48  ;;  %v2232_v50 = vpop.xlane.xlu0 %2231 }
 0xa92   : > { %3931 = vrcp.f32 %v2232_v50  ;;  %v3493_v50 = vld [vmem:[#allocation24 + $0x60] sm:$0xf] }
 0xa93   : > { %3933 = vpow2.f32 %v2417_v49 }
 0xa94   : > { %2522 = vmatpush.bf16.msra.mxu1 %v3637_v11  ;;  %v3639_v11 = vld [vmem:[#allocation24 + $0x4] sm:$0xf] }
 0xa98   : > { %v3932_v51 = vpop.eup %3931 }
 0xa99   : > { %v3934_v52 = vpop.eup %3933  ;;  %v2234_v53 = vmul.f32 %v3932_v51, %v3926_v26  ;;  %v3636_v26 = vld [vmem:[#allocation23 + $0x28] sm:$0xff] }
 0xa9a   : > { %v2419_v54 = vsel %vm1606_vm10, %v3934_v52, 0.0  ;;  %2523 = vmatpush.bf16.msra.mxu1 %v3636_v26  ;;  %v3652_v51 = vld [vmem:[#allocation24 + $0x64] sm:$0xf0] }
 0xa9b   : > { %v2235_v55 = vpack.c.bf16 %v2234_v53, %v2234_v53  ;;  %2420 = vadd.xlane.f32.xlu2 %v2419_v54  ;;  %v3494_v53 = vor.u32 %v3652_v51, %v3493_v50  ;;  %v3495_v54 = vld [vmem:[#allocation24 + $0x68] sm:$0xf0] }
 0xa9c   : > { %2363 = vrot.lane.b32.xlu1 %v2300_v36, %s4536_s22  ;;  %v3899_v36 = vld [vmem:[%s5283_s11] ss:$0 sm:$0xff] }
 0xa9d   : > { %3404 = vmatmul.msk.bf16.vlgmr.msra.gmra.mxu2 %vm1606_vm10, %v2235_v55 }
 0xa9e   : > { %2524 = vmatpush.bf16.msra.mxu1 %v3635_v27  ;;  %v3447_v27 = vld [vmem:[#allocation24 + $0x8] sm:$0xf0] }
 0xaa2   : > { %2525 = vmatpush.bf16.msra.mxu1 %v3634_v29  ;;  %v3662_v29 = vld [vmem:[#allocation26 + $0x38] sm:$0xff] }
 0xaa4   : > { %v2426_v57 = vpop.permute.xlu0 %2425 }
 0xaa5   : > { %v2431_v59 = vsel %vm1622_vm5, %v2426_v57, 0  ;;  %v3485_v57 = vld [vmem:[#allocation24 + $0x50] sm:$0xf] }
 0xaa6   : > { %v2302_v58 = vpop.permute.xlu1 %2301  ;;  %2526 = vmatpush.bf16.msra.mxu1 %v3633_v30  ;;  %v3670_v30 = vld [vmem:[#allocation26 + $0x78] sm:$0xff] }
 0xaa7   : > { %v2307_v60 = vsel %vm1622_vm5, %v2302_v58, 0  ;;  %v3650_v58 = vld [vmem:[#allocation24 + $0x54] sm:$0xf0] }
 0xaa8   : > { %2316 = vmatpush.bf16.msra.mxu0 %v2307_v60  ;;  %v3486_v60 = vor.u32 %v3650_v58, %v3485_v57 }
 0xaaa   : > { %2527 = vmatpush.bf16.msra.mxu1 %v3632_v31  ;;  %v3661_v31 = vld [vmem:[#allocation26 + $0x30] sm:$0xff] }
 0xaac   : > { %2440 = vmatpush.bf16.msrb.mxu0 %v2431_v59  ;;  %v3649_v59 = vld [vmem:[#allocation24 + $0x54] sm:$0xf] }
 0xaae   : > { %2528 = vmatpush.bf16.msra.mxu1 %v3631_v32  ;;  %v3669_v32 = vld [vmem:[#allocation26 + $0x70] sm:$0xff] }
 0xab2   : > { %2843 = vmatpush.bf16.msrb.mxu1 %v3670_v30 }
 0xab6   : > { %2844 = vmatpush.bf16.msrb.mxu1 %v3669_v32 }
 0xaf6   : > { %v2294_v61 = vpop.xlane.xlu1 %2293 }
 0xaf7   : > { %3935 = vrcp.f32 %v2294_v61 }
 0xafd   : > { %v3936_v62 = vpop.eup %3935 }
 0xafe   : > { %v2296_v63 = vmul.f32 %v3936_v62, %v3928_v41  ;;  %v3501_v41 = vld [vmem:[#allocation24 + $0x70] sm:$0xf]  ;;  %v3477_v62 = vld [vmem:[#allocation24 + $0x40] sm:$0xf] }
 0xaff   : > { %v3502_v44 = vor.u32 %v3654_v42, %v3501_v41  ;;  %v3658_v42 = vld [vmem:[#allocation26 + $0x18] sm:$0xff] }
 0xb00   : > { %v2297_v1 = vpack.c.bf16 %v2296_v63, %v2296_v63  ;;  %v2359_v0 = vpop.xlane.xlu2 %2358  ;;  %v3648_v63 = vld [vmem:[#allocation24 + $0x44] sm:$0xf0] }
 0xb01   : > { %3937 = vrcp.f32 %v2359_v0  ;;  %v3478_v0 = vor.u32 %v3648_v63, %v3477_v62 }
 0xb02   : > { %3406 = vmatmul.msk.bf16.vlgmr.msra.gmra.mxu0 %vm1606_vm10, %v2297_v1  ;;  %v3647_v1 = vld [vmem:[#allocation24 + $0x44] sm:$0xf] }
 0xb03   : > { %2830 = vmatpush.bf16.msra.mxu0 %v3662_v29 }
 0xb07   : > { %v3938_v2 = vpop.eup %3937  ;;  %2831 = vmatpush.bf16.msra.mxu0 %v3661_v31 }
 0xb08   : > { %v2361_v3 = vmul.f32 %v3938_v2, %v3930_v45  ;;  %v3503_v45 = vld [vmem:[#allocation24 + $0x78] sm:$0xf0]  ;;  %v3479_v2 = vld [vmem:[#allocation24 + $0x48] sm:$0xf0] }
 0xb09   : > { %v3506_v46 = vor.u32 %v3653_v43, %v3503_v45  ;;  %v3666_v43 = vld [vmem:[#allocation26 + $0x58] sm:$0xff] }
 0xb0a   : > { %v2362_v7 = vpack.c.bf16 %v2361_v3, %v2361_v3  ;;  %v3482_v3 = vor.u32 %v3647_v1, %v3479_v2 }
 0xb0b   : > { %2681 = vmatpush.bf16.msrb.mxu3 %v3506_v46  ;;  %v3657_v46 = vld [vmem:[#allocation26 + $0x10] sm:$0xff] }
 0xb0e   : > { %v2421_v4 = vpop.xlane.xlu2 %2420  ;;  %v2364_v5 = vpop.permute.xlu1 %2363 }
 0xb0f   : > { %3939 = vrcp.f32 %v2421_v4  ;;  %v2369_v6 = vsel %vm1622_vm5, %v2364_v5, 0  ;;  %v3469_v4 = vld [vmem:[#allocation24 + $0x30] sm:$0xf]  ;;  %v3646_v5 = vld [vmem:[#allocation24 + $0x34] sm:$0xf0] }
 0xb10   : > { %2378 = vmatpush.bf16.msrb.mxu2 %v2369_v6  ;;  %v3645_v6 = vld [vmem:[#allocation24 + $0x34] sm:$0xf] }
 0xb13   : > { %3408 = vmatmul.msk.bf16.vlgmr.msrb.gmra.mxu2 %vm1606_vm10, %v2362_v7  ;;  %v3470_v7 = vor.u32 %v3646_v5, %v3469_v4 }
 0xb14   : > { %2668 = vmatpush.bf16.msra.mxu2 %v3502_v44 }
 0xb15   : > { %v3940_v8 = vpop.eup %3939 }
 0xb16   : > { %v2423_v9 = vmul.f32 %v3940_v8, %v3934_v52  ;;  %v3651_v52 = vld [vmem:[#allocation24 + $0x64] sm:$0xf]  ;;  %v3471_v8 = vld [vmem:[#allocation24 + $0x38] sm:$0xf0] }
 0xb17   : > { %v3498_v55 = vor.u32 %v3651_v52, %v3495_v54 }
 0xb18   : > { %v2424_v12 = vpack.c.bf16 %v2423_v9, %v2423_v9  ;;  %2669 = vmatpush.bf16.msra.mxu2 %v3494_v53  ;;  %v3474_v9 = vor.u32 %v3645_v6, %v3471_v8  ;;  %v3901_v53 = vld [vmem:[%s5285_s9] ss:$0 sm:$0xff] }
 0xb19   : > { %2682 = vmatpush.bf16.msrb.mxu3 %v3498_v55 }
 0xb1a   : > { %3410 = vmatmul.msk.bf16.vlgmr.msrb.gmra.mxu0 %vm1606_vm10, %v2424_v12  ;;  %v3461_v12 = vld [vmem:[#allocation24 + $0x20] sm:$0xf] }
 0xb1c   : > { %2670 = vmatpush.bf16.msra.mxu2 %v3486_v60  ;;  %v3664_v60 = vld [vmem:[#allocation26 + $0x48] sm:$0xff] }
 0xb20   : > { %v2251_v13 = vpop.f32.mrf.mxu2  ;;  %2671 = vmatpush.bf16.msra.mxu2 %v3478_v0 }
 0xb21   : > { %v2255_v25 = vpack.c.bf16 %v2251_v13, %v2251_v13  ;;  %v3644_v13 = vld [vmem:[#allocation24 + $0x24] sm:$0xf0] }
 0xb23   : > { %2256 = vst.msk [vmem:[#allocation2] sm:$0xf] %vm1640_vm11, %v2255_v25  ;;  %v3643_v25 = vld [vmem:[#allocation24 + $0x24] sm:$0xf] }
 0xb24   : > { %2672 = vmatpush.bf16.msra.mxu2 %v3470_v7 }
 0xb28   : > { %v2253_v14 = vpop.f32.mrf.mxu2 }
 0xb29   : > { %v3462_v14 = vor.u32 %v3644_v13, %v3461_v12 }
 0xb2b   : > { %2673 = vmatpush.bf16.msra.mxu2 %v3462_v14 }
 0xb7f   : > { %v2318_v15 = vpop.f32.mrf.mxu0 }
 0xb80   : > { %v2322_v16 = vpack.c.bf16 %v2318_v15, %v2318_v15  ;;  %v3463_v15 = vld [vmem:[#allocation24 + $0x28] sm:$0xf0] }
 0xb82   : > { %2324 = vrot.lane.b32.xlu2 %v2322_v16, %s4538_s14  ;;  %v3466_v16 = vor.u32 %v3643_v25, %v3463_v15  ;;  %s5288_s14 = sld [smem:[#allocation61_spill]] }
 0xb87   : > { %v2320_v17 = vpop.f32.mrf.mxu0 }
 0xb88   : > { %v3453_v17 = vld [vmem:[#allocation24 + $0x10] sm:$0xf]  ;;  %s2869_s1 = scalar_lea.hbm %s5288_s14, %s3572_s6  ;;  %s4413_s10 = scalar_lea.hbm %s5288_s14, 16 }
 0xb89   : > { %s2873_s7 = sshll.u32 %s2869_s1, 4  ;;  %s2874_s7 = int_to_ptr.hbm [resolvable:$true] %s2873_s7 }
 0xb8a   : > { %s4407_s19 = sshra.s32 %s2874_s7, 4  ;;  %s4408_s19 = int_to_ptr.hbm [resolvable:$true] %s4407_s19 }
 0xb8b   : > { %s4409_s26 = scalar_lea.hbm %s4408_s19, 8  ;;  %p4414_p13 = scmp.lt.s32.totalorder %s4408_s19, %s5288_s14 }
 0xb8c   : > { %p4410_p5 = scmp.ne.s32.totalorder %s4408_s19, %s4409_s26  ;;  %p4415_p8 = scmp.lt.s32.totalorder %s4413_s10, %s4409_s26 }
 0xb8e   : > { %p4411_p10 = pnand %p4410_p5, %p4847_p4  ;;  %p4416_p11 = por %p4415_p8, %p4414_p13 }
 0xb90   : > { %p4412_p12 = pneg %p4411_p10 }
 0xb92   : > { %p4417_p2 = pnand %p4416_p11, %p4412_p12 }
 0xb96   : > { %v2380_v18 = vpop.f32.mrf.mxu2 }
 0xb97   : > { %v2384_v19 = vpack.c.bf16 %v2380_v18, %v2380_v18  ;;  %v2442_v20 = vpop.f32.mrf.mxu0  ;;  %v3642_v18 = vld [vmem:[#allocation24 + $0x14] sm:$0xf0] }
 0xb98   : > { %v2446_v22 = vpack.c.bf16 %v2442_v20, %v2442_v20  ;;  %v3454_v20 = vor.u32 %v3642_v18, %v3453_v17 }
 0xb99   : > { %2386 = vrot.lane.b32.xlu1 %v2384_v19, %s4536_s22  ;;  %v3641_v19 = vld [vmem:[#allocation24 + $0x14] sm:$0xf]  ;;  %s5286_s22 = sld [smem:[#allocation59_spill]] }
 0xb9a   : > { %2674 = vmatpush.bf16.msra.mxu2 %v3454_v20 }
 0xb9e   : > { %v2382_v21 = vpop.f32.mrf.mxu2 }
 0xb9f   : > { %v2444_v23 = vpop.f32.mrf.mxu0  ;;  %v3455_v21 = vld [vmem:[#allocation24 + $0x18] sm:$0xf0]  ;;  %v2582_v62 = vld [vmem:[%s5286_s22] sm:$0x3] }
 0xba0   : > { %v3445_v23 = vld [vmem:[#allocation24] sm:$0xf]  ;;  %v2585_v63 = vperm.slane %v2582_v62, 1 }
 0xba1   : > { %2448 = vrot.lane.b32.xlu1 %v2446_v22, %s4537_s4  ;;  %v3458_v22 = vor.u32 %v3641_v19, %v3455_v21  ;;  %v3446_v26 = vor.u32 %v3640_v24, %v3445_v23  ;;  %s5287_s4 = sld [smem:[#allocation60_spill]] }
 0xba3   : > { %2675 = vmatpush.bf16.msra.mxu2 %v3446_v26 }
 0xba7   : > { %v3902_v12 = vld [vmem:[%s5287_s4] ss:$0 sm:$0xff] }
 0xbdc   : > { %v2325_v28 = vpop.permute.xlu2 %2324 }
 0xbdd   : > { %2327 = vst.msk [vmem:[#allocation2] sm:$0xf] %vm1712_vm12, %v2325_v28  ;;  %v3450_v28 = vor.u32 %v3639_v11, %v3447_v27 }
 0xc0b   : > { %v2387_v33 = vpop.permute.xlu1 %2386 }
 0xc0c   : > { %2389 = vst.msk [vmem:[#allocation2] sm:$0xf] %vm1775_vm13, %v2387_v33 }
 0xc13   : > { %v2449_v34 = vpop.permute.xlu1 %2448 }
 0xc14   : > { %2451 = vst.msk [vmem:[#allocation2] sm:$0xf] %vm1838_vm14, %v2449_v34 }
 0xc1b   : > { %v2452_v35 = vld [vmem:[#allocation2] sm:$0xf] }
 0xc1c   : > { %2529 = vmatmul.bf16.vlgmr.msra.gmra.mxu1 %v2452_v35 }
 0xc99   : > { %v2530_v37 = vpop.f32.mrf.mxu1 }
 0xc9a   : > { %v2531_v38 = vadd.f32 %v3899_v36, %v2530_v37  ;;  %v3660_v36 = vld [vmem:[#allocation26 + $0x28] sm:$0xff] }
 0xc9b   : > { %v3668_v37 = vld [vmem:[#allocation26 + $0x68] sm:$0xff]  ;;  %2832 = vmatpush.bf16.msra.mxu0 %v3660_v36 }
 0xc9c   : > { %v5143_v39 = vadd.f32 %v2531_v38, %v5081_v56  ;;  %2845 = vmatpush.bf16.msrb.mxu1 %v3668_v37  ;;  %v3659_v38 = vld [vmem:[#allocation26 + $0x20] sm:$0xff] }
 0xc9e   : > { %2537 = vadd.xlane.f32.xlu0 %v5143_v39 }
 0xc9f   : > { %2833 = vmatpush.bf16.msra.mxu0 %v3659_v38 }
 0xca1   : > { %v2532_v40 = vpop.f32.mrf.mxu1 }
 0xca2   : > { %v3667_v40 = vld [vmem:[#allocation26 + $0x60] sm:$0xff] }
 0xca3   : > { %2846 = vmatpush.bf16.msrb.mxu1 %v3667_v40  ;;  %2834 = vmatpush.bf16.msra.mxu0 %v3658_v42 }
 0xca7   : > { %2847 = vmatpush.bf16.msrb.mxu1 %v3666_v43  ;;  %2835 = vmatpush.bf16.msra.mxu0 %v3657_v46 }
 0xd11   : > { %v2538_v47 = vpop.xlane.xlu0 %2537 }
 0xd12   : > { %v2539_v48 = vmul.f32 %v2538_v47, %v5024_v10  ;;  %v3487_v10 = vld [vmem:[#allocation24 + $0x58] sm:$0xf0]  ;;  %v3665_v47 = vld [vmem:[#allocation26 + $0x50] sm:$0xff] }
 0xd13   : > { %v3490_v61 = vor.u32 %v3649_v59, %v3487_v10  ;;  %2848 = vmatpush.bf16.msrb.mxu1 %v3665_v47  ;;  %v3656_v59 = vld [vmem:[#allocation26 + $0x8] sm:$0xff]  ;;  %v3655_v10 = vld [vmem:[#allocation26] sm:$0xff] }
 0xd14   : > { %v5148_v49 = vsub.f32 %v5143_v39, %v2539_v48  ;;  %2836 = vmatpush.bf16.msra.mxu0 %v3656_v59 }
 0xd15   : > { %2683 = vmatpush.bf16.msrb.mxu3 %v3490_v61  ;;  %v3663_v61 = vld [vmem:[#allocation26 + $0x40] sm:$0xff] }
 0xd16   : > { %v2541_v56 = vmul.f32 %v5148_v49, %v5148_v49 }
 0xd17   : > { %2849 = vmatpush.bf16.msrb.mxu1 %v3664_v60 }
 0xd18   : > { %2542 = vadd.xlane.f32.xlu1 %v2541_v56  ;;  %v3900_v56 = vld [vmem:[%s5284_s28] ss:$0 sm:$0xff]  ;;  %2837 = vmatpush.bf16.msra.mxu0 %v3655_v10 }
 0xd19   : > { %2684 = vmatpush.bf16.msrb.mxu3 %v3482_v3  ;;  %v2548_v52 = vmul.f32 %v3900_v56, %v5148_v49  ;;  %v2584_v49 = vperm.slane %v2582_v62, 0 }
 0xd1b   : > { %2850 = vmatpush.bf16.msrb.mxu1 %v3663_v61 }
 0xd1d   : > { %2685 = vmatpush.bf16.msrb.mxu3 %v3474_v9 }
 0xd21   : > { %2686 = vmatpush.bf16.msrb.mxu3 %v3466_v16 }
 0xd25   : > { %2687 = vmatpush.bf16.msrb.mxu3 %v3458_v22 }
 0xd29   : > { %2688 = vmatpush.bf16.msrb.mxu3 %v3450_v28 }
 0xd8b   : > { %v2543_v33 = vpop.xlane.xlu1 %2542 }
 0xd8c   : > { %v2544_v34 = vmul.f32 0.007874016, %v2543_v33 }
 0xd8e   : > { %v2549_v35 = vadd.f32 1e-06, %v2544_v34 }
 0xd90   : > { %3941 = vrsqrt.f32 %v2549_v35  ;;  %vm2556_vm4 = vweird.f32 %v2549_v35 }
 0xd96   : > { %v3942_v41 = vpop.eup %3941 }
 0xd97   : > { %v2551_v44 = vmul.f32 %v3942_v41, %v2549_v35  ;;  %vm2557_vm3 = vweird.f32 %v3942_v41 }
 0xd98   : > { %vm2558_vm5 = vmor %vm2556_vm4, %vm2557_vm3 }
 0xd99   : > { %v2552_v45 = vmul.f32 %v3942_v41, %v2551_v44 }
 0xd9b   : > { %v2553_v48 = vmul.f32 0.5, %v2552_v45 }
 0xd9d   : > { %v2554_v50 = vsub.f32 1.5, %v2553_v48 }
 0xd9f   : > { %v2555_v51 = vmul.f32 %v3942_v41, %v2554_v50 }
 0xda1   : > { %v2559_v54 = vsel %vm2558_vm5, %v3942_v41, %v2555_v51 }
 0xda2   : > { %v2560_v55 = vmul.f32 %v2559_v54, %v2548_v52 }
 0xda4   : > { %v2564_v57 = vadd.f32 %v3901_v53, %v2560_v55 }
 0xda6   : > { %v2565_v58 = vpack.c.bf16 %v2564_v57, %v2564_v57 }
 0xda8   : > { %2676 = vmatmul.bf16.vlgmr.msra.gmra.mxu2 %v2565_v58  ;;  %2689 = vmatmul.bf16.vlgmr.msrb.gmra.mxu3 %v2565_v58 }
 0xe2b   : > { %v2677_v1 = vpop.f32.mrf.mxu2  ;;  %v2690_v0 = vpop.f32.mrf.mxu3 }
 0xe2c   : > { %v2678_v2 = vadd.f32 %v2677_v1, %v2584_v49  ;;  %v2691_v3 = vadd.f32 %v2690_v0, %v2585_v63 }
 0xe2e   : > { %v2694_v4 = vmax.f32 %v2678_v2, 0.0  ;;  %v2695_v5 = vmax.f32 %v2691_v3, 0.0 }
 0xe30   : > { %v2696_v6 = vpack.c.bf16 %v2694_v4, %v2694_v4  ;;  %v2697_v7 = vpack.c.bf16 %v2695_v5, %v2695_v5 }
 0xe32   : > { %2838 = vmatmul.bf16.vlgmr.msra.gmra.mxu0 %v2696_v6  ;;  %2851 = vmatmul.bf16.vlgmr.msrb.gmra.mxu1 %v2697_v7 }
 0xe33   : > { %v2679_v8 = vpop.f32.mrf.mxu2  ;;  %v2692_v9 = vpop.f32.mrf.mxu3 }
 0xeaf   : > { %v2839_v13 = vpop.f32.mrf.mxu0  ;;  %v2852_v25 = vpop.f32.mrf.mxu1 }
 0xeb0   : > { %v2840_v14 = vadd.f32 %v3902_v12, %v2839_v13 }
 0xeb2   : > { %v2853_v15 = vadd.f32 %v2852_v25, %v2840_v14 }
 0xeb4   : > { %v2856_v16 = vadd.f32 %v2853_v15, %v5143_v39 }
 0xeb6   : > { %2857 = vst [vmem:[%s1279_s20] sm:$0xff] %v2856_v16 }
 0xeb7   : > { %v2841_v17 = vpop.f32.mrf.mxu0  ;;  %v2854_v18 = vpop.f32.mrf.mxu1 }
 0xeb8   : > { %4420 = shalt.err (!%p4417_p2)
}
 0xeb9   : > { %3725 = dma.vmem_to_hbm [thread:$0]  (%p4847_p4), %s2872_s3, 128, %s2874_s7, %s2859_s23  }
 0xeba PF: > { %s2885_s18 = sand.u32 1, %s4475_s15   ;;  %p5289_p1 = scmp.ge.s32.totalorder %s4487_s0, 2 }
 0xebb   : > { %s2886_s21 = scalar_lea.sflag [#allocation5], %s2885_s18 }
 0xebc   : > { %p3775_p7 = pnand %p5289_p1, %p4851_p3 }
 0xebe   : > { %p3776_p6 = pneg %p3775_p7 }
 0xec0   : > { %4470 = dma.done.wait (%p3776_p6), %s2886_s21, 128  }
 0xec1   : > { %4472 = vsyncadd (%p3776_p6), %s2886_s21, 4294967168  ;;  %s5290_s27 = sld [smem:[#allocation62_spill]]  ;;  %p87_p9 = scmp.ge.s32.totalorder %s4823_s29, 4  }
 0xec2   : > { %s5291_s18 = sld [smem:[#allocation65_spill]]  ;;  %s5292_s15 = smov %s4479_s16 }
 0xec3   : > { %s5294_s0 = smov %s4823_s29  ;;  %89 = sbr.rel (!%p87_p9) target bundleno = 72 (0x48), region = 300 }
 0xec7   : > { %s5293_s16 = smov %s5290_s27 }
 0xec8   :  { %2892 = vsyncpa [#allocation4], 1 }
 0xec9   :  { %2894 = vsyncpa [#allocation4 + $0x1], 1 }
 0xeca   :  { %2895 = vsyncpa [#allocation7], 1 }
 0xecb   :  { %2897 = vsyncpa [#allocation7 + $0x1], 1 }
 0xecc   :  { %2898 = vsyncpa [#allocation10], 1 }
 0xecd   :  { %2899 = vsyncpa [#allocation13], 1 }
 0xece   :  { %2900 = vsyncpa [#allocation16], 1 }
 0xecf   :  { %2901 = vsyncpa [#allocation19], 1 }
 0xed0   :  { %2902 = vsyncpa [#allocation22], 1 }
 0xed1   :  { %2903 = vsyncpa [#allocation25], 1 }
 0xed2   :  { %2904 = vsyncpa [#allocation5], 1 }
 0xed3   :  { %2906 = vsyncpa [#allocation5 + $0x1], 1 }

</bundles_post_ra>
